<compile_context>
chip_gen: v6e
topology: v6e:2x2x1
jax: 0.10.0
libtpu: 0.0.40
codegen_flags: <defaults>
</compile_context>

<pallas_src>
import functools
import math

import jax
import jax.numpy as jnp
from jax.experimental import pallas as pl
from jax.experimental.pallas import tpu as pltpu

N_DFT = 64
N_HOP = 64
N_FREQ = N_DFT // 2 + 1          # 33 onesided bins
FEAT_DIM = 32
AMIN = 1e-5
BN_EPS = 1e-5
DB_SCALE = 10.0 / math.log(10.0)  # 10*log10(x) == DB_SCALE * ln(x)
MAX_TILE_FRAMES = 32              # keeps the resident block-diag DFT <= 16 MiB bf16


# ---------------------------------------------------------------------------
# Fused kernel: windowed-DFT power -> dB -> Linear (accumulated over time tiles)
#               -> bias -> ReLU -> BatchNorm1d (batch stats, folded affine)
# ---------------------------------------------------------------------------
def _fused_kernel(x_ref, dft_ref, w_ref, affine_ref, out_ref, acc_ref):
    """One grid step = one tile of `tt` STFT frames; whole batch resident.

    x_ref      : (B, tt*64)      bf16 waveform samples of this frame tile
    dft_ref    : (tt*64, tt*128) bf16 block-diag windowed DFT; cos blocks feed output lanes
                                 [0, tt*64), sin blocks feed [tt*64, tt*128)
    w_ref      : (tt*64, 32)     bf16 permuted/zero-padded Linear weight rows of this tile
    affine_ref : (3, 32)         f32 rows = (linear bias, bn gamma, bn beta)
    out_ref    : (B, 32)         f32, written on the last step only
    acc_ref    : (B, 32)         f32 VMEM accumulator, lives across the grid
    """
    k = pl.program_id(0)

    @pl.when(k == 0)
    def _init():
        acc_ref[...] = jnp.zeros_like(acc_ref)

    half = dft_ref.shape[1] // 2                       # tt*64, a multiple of 128

    # Windowed DFT of every frame in the tile: one lane-dense MXU matmul (bf16 operands,
    # f32 accumulation).  Frame t's cos projections land in lanes [t*64, t*64+33) of the
    # first half, its sin projections at the same offsets of the second half.
    y = jnp.dot(x_ref[...], dft_ref[...], preferred_element_type=jnp.float32)  # (B, tt*128)
    y2 = y * y
    power = y2[:, :half] + y2[:, half:]                # cos^2 + sin^2, (B, tt*64)
    # Structural zero lanes (bins 33..63 of every frame, padded tail frames) stay exactly 0,
    # get clamped to amin (finite) and then multiply all-zero weight rows -> no NaN/Inf risk.
    db = DB_SCALE * jnp.log(jnp.maximum(power, AMIN))  # 10*log10(clamp(power, 1e-5))

    # Linear, accumulated over the time-tile (contraction) grid axis.  bf16 operands with a
    # f32 accumulator; dB values are O(10), so bf16 rounding (~0.1 dB) is negligible.
    acc_ref[...] += jnp.dot(db.astype(jnp.bfloat16), w_ref[...],
                            preferred_element_type=jnp.float32)

    @pl.when(k == pl.num_programs(0) - 1)
    def _finalize():
        aff = affine_ref[...]
        bias, gamma, beta = aff[0:1, :], aff[1:2, :], aff[2:3, :]
        h = jnp.maximum(acc_ref[...] + bias, 0.0)                        # bias + ReLU
        # BatchNorm1d with batch statistics (train-mode, biased variance).  Needs the whole
        # batch in one block, hence no "parallel" batch grid axis.
        mean = jnp.mean(h, axis=0, keepdims=True)
        var = jnp.mean(jnp.square(h - mean), axis=0, keepdims=True)
        scale = gamma * jax.lax.rsqrt(var + BN_EPS)
        shift = beta - mean * scale
        out_ref[...] = (h * scale + shift).astype(out_ref.dtype)


# ---------------------------------------------------------------------------
# Constant / parameter construction (deterministic, in-script)
# ---------------------------------------------------------------------------
def make_dft_halves():
    """(64, 64) windowed cos / sin DFT matrices, bins in columns [0, 33), zeros elsewhere."""
    n = jnp.arange(N_DFT, dtype=jnp.float32)
    c = jnp.arange(N_FREQ, dtype=jnp.float32)
    win = 0.5 - 0.5 * jnp.cos(2.0 * jnp.pi * n / N_DFT)        # periodic Hann (torch default)
    ang = 2.0 * jnp.pi * jnp.outer(n, c) / N_DFT               # (64, 33)
    dcos = jnp.zeros((N_DFT, N_DFT), jnp.float32)
    dcos = dcos.at[:, :N_FREQ].set(win[:, None] * jnp.cos(ang))
    dsin = jnp.zeros((N_DFT, N_DFT), jnp.float32)
    dsin = dsin.at[:, :N_FREQ].set(win[:, None] * jnp.sin(ang))
    return dcos, dsin


def make_params(mlp_size, key):
    k_w, k_b = jax.random.split(key)
    bound = 1.0 / math.sqrt(mlp_size)
    # nn.Linear default init; weight stored (out_features, in_features) like PyTorch
    w_lin = jax.random.uniform(k_w, (FEAT_DIM, mlp_size), jnp.float32, -bound, bound)
    b_lin = jax.random.uniform(k_b, (FEAT_DIM,), jnp.float32, -bound, bound)
    gamma = jnp.ones((FEAT_DIM,), jnp.float32)                 # BatchNorm1d default init
    beta = jnp.zeros((FEAT_DIM,), jnp.float32)
    return w_lin, b_lin, gamma, beta


# ---------------------------------------------------------------------------
# Forward (all trace-time glue is layout plumbing on tiny constants/weights)
# ---------------------------------------------------------------------------
@functools.partial(jax.jit, static_argnames=("tile_frames",))
def mid_spectrogram_layer_forward(x, w_lin, b_lin, gamma, beta, *, tile_frames=16):
    B, L = x.shape
    n_frames = (L - N_DFT) // N_HOP + 1            # center=False framing
    mlp_size = N_FREQ * n_frames
    assert w_lin.shape == (FEAT_DIM, mlp_size), (w_lin.shape, mlp_size)

    tt = max(2, min(tile_frames, MAX_TILE_FRAMES, n_frames))
    tt += tt % 2                                   # even tile => waveform block lanes % 128 == 0
    n_frames_pad = pl.cdiv(n_frames, tt) * tt
    grid = (n_frames_pad // tt,)

    # hop == n_fft & center=False => framing is a plain slice; zero-pad tail frames (their
    # fused-weight rows are zero, so they contribute nothing).  bf16 waveform halves its HBM
    # stream (the DFT matmul runs in bf16 anyway).
    xw = x[:, : n_frames * N_DFT]
    if n_frames_pad != n_frames:
        xw = jnp.pad(xw, ((0, 0), (0, (n_frames_pad - n_frames) * N_DFT)))
    xw = xw.astype(jnp.bfloat16)

    # Per-tile block-diagonal windowed DFT (constant, resident): cos blocks in output lanes
    # [0, tt*64), sin blocks in [tt*64, tt*128) so no roll is needed and each frame uses only
    # 64 dB / weight lanes.
    dcos, dsin = make_dft_halves()
    eye_tt = jnp.eye(tt, dtype=jnp.float32)
    dft_bd = jnp.concatenate([jnp.kron(eye_tt, dcos), jnp.kron(eye_tt, dsin)],
                             axis=1).astype(jnp.bfloat16)       # (tt*64, tt*128)

    # Fold PyTorch's (B, freq, time) -> reshape(B, -1) flatten (index = freq*T + t) into the
    # Linear weight: fused row t*64 + c  <-  w_lin[:, c*T + t] for c < 33, zero otherwise.
    # Stored bf16: this is the dominant per-step HBM stream.
    w3 = w_lin.reshape(FEAT_DIM, N_FREQ, n_frames)              # [f, freq, t]
    w3 = jnp.transpose(w3, (2, 1, 0))                           # [t, freq, f]
    w3 = jnp.pad(w3, ((0, n_frames_pad - n_frames), (0, N_DFT - N_FREQ), (0, 0)))
    w_fused = w3.reshape(n_frames_pad * N_DFT, FEAT_DIM).astype(jnp.bfloat16)

    affine = jnp.stack([b_lin, gamma, beta], axis=0)            # (3, 32) f32

    # Explicit VMEM budget: double-buffered inputs + accumulator + headroom for the
    # y / power / db intermediates; capped at 48 MiB to leave slack in v7x's 64 MiB VMEM.
    dft_bytes = int(dft_bd.size) * 2
    x_tile_bytes = B * tt * N_DFT * 2
    w_tile_bytes = tt * N_DFT * FEAT_DIM * 2
    inter_bytes = 4 * B * tt * (2 * N_DFT) * 4
    budget = 2 * (dft_bytes + x_tile_bytes + w_tile_bytes) + inter_bytes + (1 << 20)
    vmem_limit = int(min(max(2 * budget, 32 << 20), 48 << 20))

    return pl.pallas_call(
        _fused_kernel,
        out_shape=jax.ShapeDtypeStruct((B, FEAT_DIM), jnp.float32),
        grid_spec=pltpu.PrefetchScalarGridSpec(
            num_scalar_prefetch=0,
            grid=grid,
            in_specs=[
                pl.BlockSpec((B, tt * N_DFT), lambda k: (0, k)),               # waveform tile
                pl.BlockSpec((tt * N_DFT, tt * 2 * N_DFT), lambda k: (0, 0)),  # DFT (resident)
                pl.BlockSpec((tt * N_DFT, FEAT_DIM), lambda k: (k, 0)),        # weight tile
                pl.BlockSpec((3, FEAT_DIM), lambda k: (0, 0)),                 # bias/gamma/beta
            ],
            out_specs=pl.BlockSpec((B, FEAT_DIM), lambda k: (0, 0)),
            scratch_shapes=[pltpu.VMEM((B, FEAT_DIM), jnp.float32)],
        ),
        compiler_params=pltpu.CompilerParams(
            dimension_semantics=("arbitrary",),    # time axis is the Linear contraction
            vmem_limit_bytes=vmem_limit,
        ),
    )(xw, dft_bd, w_fused, affine)


if __name__ == "__main__":
    key = jax.random.PRNGKey(0)
    k_x, k_p = jax.random.split(key)

    B, L = 2, 512                                  # -> n_frames = 8, mlp_size = 33*8 = 264
    n_frames = (L - N_DFT) // N_HOP + 1
    mlp_size = N_FREQ * n_frames

    x = jax.random.normal(k_x, (B, L), dtype=jnp.float32)
    w_lin, b_lin, gamma, beta = make_params(mlp_size, k_p)

    out = mid_spectrogram_layer_forward(x, w_lin, b_lin, gamma, beta, tile_frames=16)
    out = jax.block_until_ready(out)
    assert out.shape == (B, FEAT_DIM), out.shape
    assert bool(jnp.all(jnp.isfinite(out)))

    # Also exercise the multi-step (pipelined, accumulating) grid path and check consistency.
    out_tiled = mid_spectrogram_layer_forward(x, w_lin, b_lin, gamma, beta, tile_frames=2)
    out_tiled = jax.block_until_ready(out_tiled)
    assert out_tiled.shape == (B, FEAT_DIM), out_tiled.shape
    assert bool(jnp.all(jnp.isfinite(out_tiled)))
    assert bool(jnp.allclose(out, out_tiled, atol=5e-2, rtol=5e-2))

    print("KERNEL_OK")
</pallas_src>

<mosaic_0001>
module attributes {stable_mosaic.version = 11 : i64} {
  func.func @_fused_kernel(%arg0: i32, %arg1: memref<2x512xbf16, #tpu.memory_space<vmem>>, %arg2: memref<512x1024xbf16, #tpu.memory_space<vmem>>, %arg3: memref<512x32xbf16, #tpu.memory_space<vmem>>, %arg4: memref<3x32xf32, #tpu.memory_space<vmem>>, %arg5: memref<2x32xf32, #tpu.memory_space<vmem>>, %arg6: memref<2x32xf32, #tpu.memory_space<vmem>>) attributes {dimension_semantics = [#tpu.dimension_semantics<arbitrary>], iteration_bounds = array<i64: 1>, scalar_prefetch = 0 : i64, scratch_operands = 1 : i64, tpu.core_type = #tpu.core_type<tc>, window_params = [{transform_indices = @transform_0, window_bounds = array<i64: 2, 512>}, {pipeline_mode = #tpu.pipeline_mode<synchronous>, transform_indices = @transform_1, window_bounds = array<i64: 512, 1024>}, {transform_indices = @transform_2, window_bounds = array<i64: 512, 32>}, {pipeline_mode = #tpu.pipeline_mode<synchronous>, transform_indices = @transform_3, window_bounds = array<i64: 3, 32>}, {pipeline_mode = #tpu.pipeline_mode<synchronous>, transform_indices = @transform_4, window_bounds = array<i64: 2, 32>}]} {
    %c0_i32 = arith.constant 0 : i32
    %0 = arith.cmpi eq, %arg0, %c0_i32 : i32
    %1 = arith.extui %0 : i1 to i32
    %c0_i32_0 = arith.constant 0 : i32
    %2 = arith.cmpi ne, %1, %c0_i32_0 : i32
    scf.if %2 {
      %cst_15 = arith.constant 0.000000e+00 : f32
      %24 = vector.broadcast %cst_15 : f32 to vector<2x32xf32>
      %c0_16 = arith.constant 0 : index
      %c0_17 = arith.constant 0 : index
      %25 = vector.load %arg6[%c0_16, %c0_17] : memref<2x32xf32, #tpu.memory_space<vmem>>, vector<2x32xf32>
      tpu.vector_store %arg6[%c0_16, %c0_17], %24 {strides = array<i32>} : memref<2x32xf32, #tpu.memory_space<vmem>>, vector<2x32xf32>,
    } else {
    }
    %c0 = arith.constant 0 : index
    %c0_1 = arith.constant 0 : index
    %3 = vector.load %arg1[%c0, %c0_1] : memref<2x512xbf16, #tpu.memory_space<vmem>>, vector<2x512xbf16>
    %c0_2 = arith.constant 0 : index
    %c0_3 = arith.constant 0 : index
    %4 = vector.load %arg2[%c0_2, %c0_3] : memref<512x1024xbf16, #tpu.memory_space<vmem>>, vector<512x1024xbf16>
    %cst = arith.constant dense<0.000000e+00> : vector<2x1024xf32>
    %5 = tpu.matmul %3, %4, %cst {dimension_numbers = #tpu.dot_dimension_numbers<[1], [0], [0], [1], [0, 0, 1, 1], [], []>} : vector<2x512xbf16>, vector<512x1024xbf16>, vector<2x1024xf32> -> vector<2x1024xf32>
    %6 = arith.mulf %5, %5 : vector<2x1024xf32>
    %7 = vector.extract_strided_slice %6 {offsets = [0, 0], sizes = [2, 512], strides = [1, 1]} : vector<2x1024xf32> to vector<2x512xf32>
    %8 = vector.extract_strided_slice %6 {offsets = [0, 512], sizes = [2, 512], strides = [1, 1]} : vector<2x1024xf32> to vector<2x512xf32>
    %9 = arith.addf %7, %8 : vector<2x512xf32>
    %cst_4 = arith.constant 9.99999974E-6 : f32
    %10 = vector.broadcast %cst_4 : f32 to vector<2x512xf32>
    %11 = arith.maximumf %9, %10 : vector<2x512xf32>
    %12 = math.log %11 : vector<2x512xf32>
    %cst_5 = arith.constant 4.34294462 : f32
    %13 = vector.broadcast %cst_5 : f32 to vector<2x512xf32>
    %14 = arith.mulf %13, %12 : vector<2x512xf32>
    %c0_6 = arith.constant 0 : index
    %c0_7 = arith.constant 0 : index
    %15 = vector.load %arg6[%c0_6, %c0_7] : memref<2x32xf32, #tpu.memory_space<vmem>>, vector<2x32xf32>
    %16 = arith.truncf %14 : vector<2x512xf32> to vector<2x512xbf16>
    %c0_8 = arith.constant 0 : index
    %c0_9 = arith.constant 0 : index
    %17 = vector.load %arg3[%c0_8, %c0_9] : memref<512x32xbf16, #tpu.memory_space<vmem>>, vector<512x32xbf16>
    %cst_10 = arith.constant dense<0.000000e+00> : vector<2x32xf32>
    %18 = tpu.matmul %16, %17, %cst_10 {dimension_numbers = #tpu.dot_dimension_numbers<[1], [0], [0], [1], [0, 0, 1, 1], [], []>} : vector<2x512xbf16>, vector<512x32xbf16>, vector<2x32xf32> -> vector<2x32xf32>
    %19 = arith.addf %15, %18 : vector<2x32xf32>
    %c0_11 = arith.constant 0 : index
    %c0_12 = arith.constant 0 : index
    %20 = vector.load %arg6[%c0_11, %c0_12] : memref<2x32xf32, #tpu.memory_space<vmem>>, vector<2x32xf32>
    tpu.vector_store %arg6[%c0_11, %c0_12], %19 {strides = array<i32>} : memref<2x32xf32, #tpu.memory_space<vmem>>, vector<2x32xf32>,
    %c0_i32_13 = arith.constant 0 : i32
    %21 = arith.cmpi eq, %arg0, %c0_i32_13 : i32
    %22 = arith.extui %21 : i1 to i32
    %c0_i32_14 = arith.constant 0 : i32
    %23 = arith.cmpi ne, %22, %c0_i32_14 : i32
    scf.if %23 {
      %c0_15 = arith.constant 0 : index
      %c0_16 = arith.constant 0 : index
      %24 = vector.load %arg4[%c0_15, %c0_16] : memref<3x32xf32, #tpu.memory_space<vmem>>, vector<3x32xf32>
      %25 = vector.extract_strided_slice %24 {offsets = [0, 0], sizes = [1, 32], strides = [1, 1]} : vector<3x32xf32> to vector<1x32xf32>
      %26 = vector.extract_strided_slice %24 {offsets = [1, 0], sizes = [1, 32], strides = [1, 1]} : vector<3x32xf32> to vector<1x32xf32>
      %27 = vector.extract_strided_slice %24 {offsets = [2, 0], sizes = [1, 32], strides = [1, 1]} : vector<3x32xf32> to vector<1x32xf32>
      %c0_17 = arith.constant 0 : index
      %c0_18 = arith.constant 0 : index
      %28 = vector.load %arg6[%c0_17, %c0_18] : memref<2x32xf32, #tpu.memory_space<vmem>>, vector<2x32xf32>
      %29 = vector.broadcast %25 : vector<1x32xf32> to vector<2x32xf32>
      %30 = arith.addf %28, %29 : vector<2x32xf32>
      %cst_19 = arith.constant 0.000000e+00 : f32
      %31 = vector.broadcast %cst_19 : f32 to vector<2x32xf32>
      %32 = arith.maximumf %30, %31 : vector<2x32xf32>
      %cst_20 = arith.constant dense<0.000000e+00> : vector<32xf32>
      %33 = vector.multi_reduction <add>, %32, %cst_20 [0] : vector<2x32xf32> to vector<32xf32>
      %34 = vector.shape_cast %33 : vector<32xf32> to vector<1x32xf32>
      %cst_21 = arith.constant 2.000000e+00 : f32
      %35 = vector.broadcast %cst_21 : f32 to vector<1x32xf32>
      %36 = arith.divf %34, %35 : vector<1x32xf32>
      %37 = vector.broadcast %36 : vector<1x32xf32> to vector<2x32xf32>
      %38 = arith.subf %32, %37 : vector<2x32xf32>
      %39 = arith.mulf %38, %38 : vector<2x32xf32>
      %cst_22 = arith.constant dense<0.000000e+00> : vector<32xf32>
      %40 = vector.multi_reduction <add>, %39, %cst_22 [0] : vector<2x32xf32> to vector<32xf32>
      %41 = vector.shape_cast %40 : vector<32xf32> to vector<1x32xf32>
      %cst_23 = arith.constant 2.000000e+00 : f32
      %42 = vector.broadcast %cst_23 : f32 to vector<1x32xf32>
      %43 = arith.divf %41, %42 : vector<1x32xf32>
      %cst_24 = arith.constant 9.99999974E-6 : f32
      %44 = vector.broadcast %cst_24 : f32 to vector<1x32xf32>
      %45 = arith.addf %43, %44 : vector<1x32xf32>
      %46 = math.rsqrt %45 : vector<1x32xf32>
      %47 = arith.mulf %26, %46 : vector<1x32xf32>
      %48 = arith.mulf %36, %47 : vector<1x32xf32>
      %49 = arith.subf %27, %48 : vector<1x32xf32>
      %50 = vector.broadcast %47 : vector<1x32xf32> to vector<2x32xf32>
      %51 = arith.mulf %32, %50 : vector<2x32xf32>
      %52 = vector.broadcast %49 : vector<1x32xf32> to vector<2x32xf32>
      %53 = arith.addf %51, %52 : vector<2x32xf32>
      %c0_25 = arith.constant 0 : index
      %c0_26 = arith.constant 0 : index
      %54 = vector.load %arg5[%c0_25, %c0_26] : memref<2x32xf32, #tpu.memory_space<vmem>>, vector<2x32xf32>
      tpu.vector_store %arg5[%c0_25, %c0_26], %53 {strides = array<i32>} : memref<2x32xf32, #tpu.memory_space<vmem>>, vector<2x32xf32>,
    } else {
    }
    return
  }
  func.func @transform_0(%arg0: i32) -> (i32, i32) {
    %c0_i32 = arith.constant 0 : i32
    %c0_i32_0 = arith.constant 0 : i32
    return %c0_i32, %arg0 : i32, i32
  }
  func.func @transform_1(%arg0: i32) -> (i32, i32) {
    %c0_i32 = arith.constant 0 : i32
    %c0_i32_0 = arith.constant 0 : i32
    %c0_i32_1 = arith.constant 0 : i32
    return %c0_i32, %c0_i32_0 : i32, i32
  }
  func.func @transform_2(%arg0: i32) -> (i32, i32) {
    %c0_i32 = arith.constant 0 : i32
    %c0_i32_0 = arith.constant 0 : i32
    return %arg0, %c0_i32 : i32, i32
  }
  func.func @transform_3(%arg0: i32) -> (i32, i32) {
    %c0_i32 = arith.constant 0 : i32
    %c0_i32_0 = arith.constant 0 : i32
    %c0_i32_1 = arith.constant 0 : i32
    return %c0_i32, %c0_i32_0 : i32, i32
  }
  func.func @transform_4(%arg0: i32) -> (i32, i32) {
    %c0_i32 = arith.constant 0 : i32
    %c0_i32_0 = arith.constant 0 : i32
    %c0_i32_1 = arith.constant 0 : i32
    return %c0_i32, %c0_i32_0 : i32, i32
  }
}

</mosaic_0001>

<bundles_post_ra>
// kernel: mid_spectrogram_layer_forward.1
= control target key start
LH: loop header
LB: loop body
LE: loop exit
PB: predicated region body
PF: predicated region fallthrough
CT: control target
= control target key end

     0   :  { %v2754_v35 = vmov 1966171168   ;;  %v294_v37 = vlaneseq  ;;  %s3719_s0 = inlined_call_operand.vmem [shape: bf16[2,512], index: 0, kind: input, shape index: {}]   ;;  %s3720_s1 = inlined_call_operand.vmem [shape: bf16[512,1024], index: 1, kind: input, shape index: {}]   ;;  %s3721_s2 = inlined_call_operand.vmem [shape: bf16[512,32], index: 2, kind: input, shape index: {}]   ;;  %s3722_s3 = inlined_call_operand.vmem [shape: f32[3,32], index: 3, kind: input, shape index: {}]   ;;  %s3723_s4 = inlined_call_operand.hbm [shape: f32[2,32], index: 4, kind: output, shape index: {}]  }
   0x1   :  { %v82_v0 = vld [vmem:[%s3720_s1 + $0x1c0] sm:$0xff]  ;;  %v292_v36 = vunpack.c.l.s4 %v2754_v35 }
   0x2   :  { %v86_v1 = vld [vmem:[%s3720_s1 + $0x1e0] sm:$0xff]  ;;  %v2854_v47 = vshrl.u32 %v294_v37, 7 }
   0x3   :  { %v210_v2 = vld [vmem:[%s3720_s1 + $0x5c0] sm:$0xff]  ;;  %v2412_v3 = vcombine.high %v82_v0, %v86_v1  ;;  %v2411_v5 = vcombine.low %v82_v0, %v86_v1  ;;  %v293_v46 = vunpack.c.0.s8 %v292_v36 }
   0x4   :  { %v214_v4 = vld [vmem:[%s3720_s1 + $0x5e0] sm:$0xff] }
   0x5   :  { %v74_v6 = vld [vmem:[%s3720_s1 + $0x180] sm:$0xff]  ;;  %v2540_v8 = vcombine.high %v210_v2, %v214_v4  ;;  %v2539_v9 = vcombine.low %v210_v2, %v214_v4  ;;  %1591 = vmatprep.subr.bf16.mxu0 %v2412_v3  ;;  %v2869_v56 = vsub.s32 %v293_v46, %v2854_v47 }
   0x6   :  { %v78_v7 = vld [vmem:[%s3720_s1 + $0x1a0] sm:$0xff]  ;;  %1592 = vmatpush1.bf16.msra.mxu0 %v2411_v5 }
   0x7   :  { %v2404_v10 = vcombine.high %v74_v6, %v78_v7  ;;  %v202_v11 = vld [vmem:[%s3720_s1 + $0x580] sm:$0xff]  ;;  %1632 = vmatprep.subr.bf16.mxu1 %v2540_v8  ;;  %v2403_v18 = vcombine.low %v74_v6, %v78_v7 }
   0x8   :  { %v206_v12 = vld [vmem:[%s3720_s1 + $0x5a0] sm:$0xff]  ;;  %1633 = vmatpush1.bf16.msra.mxu1 %v2539_v9 }
   0x9   :  { %v66_v13 = vld [vmem:[%s3720_s1 + $0x140] sm:$0xff]  ;;  %v2532_v14 = vcombine.high %v202_v11, %v206_v12  ;;  %1593 = vmatprep.subr.bf16.mxu0 %v2404_v10  ;;  %v2531_v19 = vcombine.low %v202_v11, %v206_v12 }
   0xa   :  { %v70_v15 = vld [vmem:[%s3720_s1 + $0x160] sm:$0xff]  ;;  %1594 = vmatpush1.bf16.msra.mxu0 %v2403_v18 }
   0xb   :  { %v194_v16 = vld [vmem:[%s3720_s1 + $0x540] sm:$0xff]  ;;  %v2396_v20 = vcombine.high %v66_v13, %v70_v15  ;;  %1634 = vmatprep.subr.bf16.mxu1 %v2532_v14  ;;  %v2395_v26 = vcombine.low %v66_v13, %v70_v15 }
   0xc   :  { %v198_v17 = vld [vmem:[%s3720_s1 + $0x560] sm:$0xff]  ;;  %1635 = vmatpush1.bf16.msra.mxu1 %v2531_v19 }
   0xd   :  { %v2524_v21 = vcombine.high %v194_v16, %v198_v17  ;;  %v58_v22 = vld [vmem:[%s3720_s1 + $0x100] sm:$0xff]  ;;  %1595 = vmatprep.subr.bf16.mxu0 %v2396_v20  ;;  %v2523_v27 = vcombine.low %v194_v16, %v198_v17 }
   0xe   :  { %v62_v23 = vld [vmem:[%s3720_s1 + $0x120] sm:$0xff]  ;;  %1596 = vmatpush1.bf16.msra.mxu0 %v2395_v26 }
   0xf   :  { %v186_v24 = vld [vmem:[%s3720_s1 + $0x500] sm:$0xff]  ;;  %v2388_v28 = vcombine.high %v58_v22, %v62_v23  ;;  %1636 = vmatprep.subr.bf16.mxu1 %v2524_v21  ;;  %v2387_v34 = vcombine.low %v58_v22, %v62_v23 }
  0x10   :  { %v190_v25 = vld [vmem:[%s3720_s1 + $0x520] sm:$0xff]  ;;  %1637 = vmatpush1.bf16.msra.mxu1 %v2523_v27 }
  0x11   :  { %v2516_v29 = vcombine.high %v186_v24, %v190_v25  ;;  %v50_v30 = vld [vmem:[%s3720_s1 + $0xc0] sm:$0xff]  ;;  %1597 = vmatprep.subr.bf16.mxu0 %v2388_v28  ;;  %v2515_v38 = vcombine.low %v186_v24, %v190_v25 }
  0x12   :  { %v54_v31 = vld [vmem:[%s3720_s1 + $0xe0] sm:$0xff]  ;;  %1598 = vmatpush1.bf16.msra.mxu0 %v2387_v34 }
  0x13   :  { %v178_v32 = vld [vmem:[%s3720_s1 + $0x4c0] sm:$0xff]  ;;  %v2380_v39 = vcombine.high %v50_v30, %v54_v31  ;;  %1638 = vmatprep.subr.bf16.mxu1 %v2516_v29  ;;  %v2379_v45 = vcombine.low %v50_v30, %v54_v31 }
  0x14   :  { %v182_v33 = vld [vmem:[%s3720_s1 + $0x4e0] sm:$0xff]  ;;  %1639 = vmatpush1.bf16.msra.mxu1 %v2515_v38 }
  0x15   :  { %v2508_v40 = vcombine.high %v178_v32, %v182_v33  ;;  %v42_v41 = vld [vmem:[%s3720_s1 + $0x80] sm:$0xff]  ;;  %1599 = vmatprep.subr.bf16.mxu0 %v2380_v39  ;;  %v2507_v48 = vcombine.low %v178_v32, %v182_v33 }
  0x16   :  { %v46_v42 = vld [vmem:[%s3720_s1 + $0xa0] sm:$0xff]  ;;  %1600 = vmatpush1.bf16.msra.mxu0 %v2379_v45 }
  0x17   :  { %v170_v43 = vld [vmem:[%s3720_s1 + $0x480] sm:$0xff]  ;;  %v2372_v49 = vcombine.high %v42_v41, %v46_v42  ;;  %1640 = vmatprep.subr.bf16.mxu1 %v2508_v40  ;;  %v2371_v55 = vcombine.low %v42_v41, %v46_v42 }
  0x18   :  { %v174_v44 = vld [vmem:[%s3720_s1 + $0x4a0] sm:$0xff]  ;;  %1641 = vmatpush1.bf16.msra.mxu1 %v2507_v48 }
  0x19   :  { %v2500_v50 = vcombine.high %v170_v43, %v174_v44  ;;  %v34_v51 = vld [vmem:[%s3720_s1 + $0x40] sm:$0xff]  ;;  %1601 = vmatprep.subr.bf16.mxu0 %v2372_v49  ;;  %v2499_v57 = vcombine.low %v170_v43, %v174_v44 }
  0x1a   :  { %v38_v52 = vld [vmem:[%s3720_s1 + $0x60] sm:$0xff]  ;;  %1602 = vmatpush1.bf16.msra.mxu0 %v2371_v55 }
  0x1b   :  { %v162_v53 = vld [vmem:[%s3720_s1 + $0x440] sm:$0xff]  ;;  %v2364_v58 = vcombine.high %v34_v51, %v38_v52  ;;  %1642 = vmatprep.subr.bf16.mxu1 %v2500_v50  ;;  %v2363_v2 = vcombine.low %v34_v51, %v38_v52 }
  0x1c   :  { %v166_v54 = vld [vmem:[%s3720_s1 + $0x460] sm:$0xff]  ;;  %1643 = vmatpush1.bf16.msra.mxu1 %v2499_v57 }
  0x1d   :  { %v2874_v59 = vld.sshfl [vmem:[%s3719_s0] sm:$0x33 pattern:$0x75316420]  ;;  %v2492_v60 = vcombine.high %v162_v53, %v166_v54  ;;  %1603 = vmatprep.subr.bf16.mxu0 %v2364_v58  ;;  %v2491_v4 = vcombine.low %v162_v53, %v166_v54 }
  0x1e   :  { %v26_v61 = vld [vmem:[%s3720_s1] sm:$0xff]  ;;  %v290_v63 = vcombine.high %v2874_v59, %v2874_v59  ;;  %1604 = vmatpush1.bf16.msra.mxu0 %v2363_v2 }
  0x1f   :  { %v30_v62 = vld [vmem:[%s3720_s1 + $0x20] sm:$0xff]  ;;  %1644 = vmatprep.subr.bf16.mxu1 %v2492_v60 }
  0x20   :  { %v154_v0 = vld [vmem:[%s3720_s1 + $0x400] sm:$0xff]  ;;  %v2891_v3 = vrot.slane %v290_v63, %v2869_v56  ;;  %v2356_v5 = vcombine.high %v26_v61, %v30_v62  ;;  %v2355_v12 = vcombine.low %v26_v61, %v30_v62  ;;  %1645 = vmatpush1.bf16.msra.mxu1 %v2491_v4 }
  0x21   :  { %v158_v1 = vld [vmem:[%s3720_s1 + $0x420] sm:$0xff] }
  0x22   :  { %v2484_v6 = vcombine.high %v154_v0, %v158_v1  ;;  %v146_v7 = vld [vmem:[%s3720_s1 + $0x3c0] sm:$0xff]  ;;  %1623 = vmatprep.mubr.bf16.mxu0 %v2891_v3  ;;  %v2902_v9 = vcombine.high %v2891_v3, %v2891_v3  ;;  %1605 = vmatprep.subr.bf16.mxu0 %v2356_v5  ;;  %v2483_v13 = vcombine.low %v154_v0, %v158_v1 }
  0x23   :  { %v150_v8 = vld [vmem:[%s3720_s1 + $0x3e0] sm:$0xff]  ;;  %1606 = vmatpush1.bf16.msra.mxu0 %v2355_v12 }
  0x24   :  { %v274_v10 = vld [vmem:[%s3720_s1 + $0x7c0] sm:$0xff]  ;;  %1664 = vmatprep.mubr.bf16.mxu1 %v2902_v9  ;;  %v2476_v14 = vcombine.high %v146_v7, %v150_v8  ;;  %1646 = vmatprep.subr.bf16.mxu1 %v2484_v6  ;;  %v2475_v20 = vcombine.low %v146_v7, %v150_v8 }
  0x25   :  { %v278_v11 = vld [vmem:[%s3720_s1 + $0x7e0] sm:$0xff]  ;;  %1647 = vmatpush1.bf16.msra.mxu1 %v2483_v13  ;;  %v83_v13 = vld [vmem:[%s3720_s1 + $0x1c8] sm:$0xff] }
  0x26   :  { %v2604_v15 = vcombine.high %v274_v10, %v278_v11  ;;  %v138_v16 = vld [vmem:[%s3720_s1 + $0x380] sm:$0xff]  ;;  %1607 = vmatprep.subr.bf16.mxu0 %v2476_v14  ;;  %v2603_v21 = vcombine.low %v274_v10, %v278_v11  ;;  %v87_v14 = vld [vmem:[%s3720_s1 + $0x1e8] sm:$0xff] }
  0x27   :  { %v142_v17 = vld [vmem:[%s3720_s1 + $0x3a0] sm:$0xff]  ;;  %1608 = vmatpush2.bf16.msra.mxu0 %v2475_v20  ;;  %v2414_v20 = vcombine.high %v83_v13, %v87_v14 }
  0x28   :  { %v266_v18 = vld [vmem:[%s3720_s1 + $0x780] sm:$0xff]  ;;  %v2468_v22 = vcombine.high %v138_v16, %v142_v17  ;;  %1648 = vmatprep.subr.bf16.mxu1 %v2604_v15  ;;  %v2467_v28 = vcombine.low %v138_v16, %v142_v17  ;;  %v211_v15 = vld [vmem:[%s3720_s1 + $0x5c8] sm:$0xff] }
  0x29   :  { %v270_v19 = vld [vmem:[%s3720_s1 + $0x7a0] sm:$0xff]  ;;  %1649 = vmatpush2.bf16.msra.mxu1 %v2603_v21  ;;  %v215_v16 = vld [vmem:[%s3720_s1 + $0x5e8] sm:$0xff] }
  0x2a   :  { %v2596_v23 = vcombine.high %v266_v18, %v270_v19  ;;  %v130_v24 = vld [vmem:[%s3720_s1 + $0x340] sm:$0xff]  ;;  %1609 = vmatprep.subr.bf16.mxu0 %v2468_v22  ;;  %v2595_v29 = vcombine.low %v266_v18, %v270_v19  ;;  %v3009_v18 = vrot.slane %v2874_v59, %v2869_v56  ;;  %v2542_v21 = vcombine.high %v211_v15, %v215_v16  ;;  %v75_v22 = vld [vmem:[%s3720_s1 + $0x188] sm:$0xff] }
  0x2b   :  { %v134_v25 = vld [vmem:[%s3720_s1 + $0x360] sm:$0xff]  ;;  %1610 = vmatpush2.bf16.msra.mxu0 %v2467_v28  ;;  %v207_v56 = vld [vmem:[%s3720_s1 + $0x5a8] sm:$0xff] }
  0x2c   :  { %v258_v26 = vld [vmem:[%s3720_s1 + $0x740] sm:$0xff]  ;;  %v2460_v30 = vcombine.high %v130_v24, %v134_v25  ;;  %1650 = vmatprep.subr.bf16.mxu1 %v2596_v23  ;;  %v2459_v36 = vcombine.low %v130_v24, %v134_v25  ;;  %v79_v23 = vld [vmem:[%s3720_s1 + $0x1a8] sm:$0xff]  ;;  %v3025_v59 = vcombine.high %v3009_v18, %v3009_v18  ;;  %v2413_v25 = vcombine.low %v83_v13, %v87_v14 }
  0x2d   :  { %v262_v27 = vld [vmem:[%s3720_s1 + $0x760] sm:$0xff]  ;;  %1651 = vmatpush2.bf16.msra.mxu1 %v2595_v29  ;;  %v203_v24 = vld [vmem:[%s3720_s1 + $0x588] sm:$0xff] }
  0x2e   :  { %v2588_v31 = vcombine.high %v258_v26, %v262_v27  ;;  %v122_v32 = vld [vmem:[%s3720_s1 + $0x300] sm:$0xff]  ;;  %1611 = vmatprep.subr.bf16.mxu0 %v2460_v30  ;;  %v2587_v37 = vcombine.low %v258_v26, %v262_v27  ;;  %v2541_v26 = vcombine.low %v211_v15, %v215_v16  ;;  %v2406_v27 = vcombine.high %v75_v22, %v79_v23  ;;  %v67_v28 = vld [vmem:[%s3720_s1 + $0x148] sm:$0xff] }
  0x2f   :  { %v126_v33 = vld [vmem:[%s3720_s1 + $0x320] sm:$0xff]  ;;  %1612 = vmatpush2.bf16.msra.mxu0 %v2459_v36  ;;  %v71_v29 = vld [vmem:[%s3720_s1 + $0x168] sm:$0xff] }
  0x30   :  { %v250_v34 = vld [vmem:[%s3720_s1 + $0x700] sm:$0xff]  ;;  %v2452_v38 = vcombine.high %v122_v32, %v126_v33  ;;  %1652 = vmatprep.subr.bf16.mxu1 %v2588_v31  ;;  %v2451_v44 = vcombine.low %v122_v32, %v126_v33  ;;  %v195_v30 = vld [vmem:[%s3720_s1 + $0x548] sm:$0xff]  ;;  %v2534_v31 = vcombine.high %v203_v24, %v207_v56  ;;  %v2405_v33 = vcombine.low %v75_v22, %v79_v23 }
  0x31   :  { %v254_v35 = vld [vmem:[%s3720_s1 + $0x720] sm:$0xff]  ;;  %1653 = vmatpush2.bf16.msra.mxu1 %v2587_v37  ;;  %v199_v32 = vld [vmem:[%s3720_s1 + $0x568] sm:$0xff] }
  0x32   :  { %v2580_v39 = vcombine.high %v250_v34, %v254_v35  ;;  %v114_v40 = vld [vmem:[%s3720_s1 + $0x2c0] sm:$0xff]  ;;  %1613 = vmatprep.subr.bf16.mxu0 %v2452_v38  ;;  %v2579_v45 = vcombine.low %v250_v34, %v254_v35  ;;  %v2533_v34 = vcombine.low %v203_v24, %v207_v56  ;;  %v2398_v35 = vcombine.high %v67_v28, %v71_v29  ;;  %v59_v36 = vld [vmem:[%s3720_s1 + $0x108] sm:$0xff] }
  0x33   :  { %v118_v41 = vld [vmem:[%s3720_s1 + $0x2e0] sm:$0xff]  ;;  %1614 = vmatpush2.bf16.msra.mxu0 %v2451_v44  ;;  %v63_v37 = vld [vmem:[%s3720_s1 + $0x128] sm:$0xff] }
  0x34   :  { %v242_v42 = vld [vmem:[%s3720_s1 + $0x6c0] sm:$0xff]  ;;  %v2444_v46 = vcombine.high %v114_v40, %v118_v41  ;;  %1654 = vmatprep.subr.bf16.mxu1 %v2580_v39  ;;  %v2443_v53 = vcombine.low %v114_v40, %v118_v41  ;;  %v187_v38 = vld [vmem:[%s3720_s1 + $0x508] sm:$0xff]  ;;  %v2526_v39 = vcombine.high %v195_v30, %v199_v32  ;;  %v2397_v41 = vcombine.low %v67_v28, %v71_v29 }
  0x35   :  { %v246_v43 = vld [vmem:[%s3720_s1 + $0x6e0] sm:$0xff]  ;;  %1655 = vmatpush2.bf16.msra.mxu1 %v2579_v45  ;;  %v191_v40 = vld [vmem:[%s3720_s1 + $0x528] sm:$0xff] }
  0x36   :  { %v2572_v48 = vcombine.high %v242_v42, %v246_v43  ;;  %v106_v49 = vld [vmem:[%s3720_s1 + $0x280] sm:$0xff]  ;;  %1615 = vmatprep.subr.bf16.mxu0 %v2444_v46  ;;  %v2571_v54 = vcombine.low %v242_v42, %v246_v43  ;;  %v2525_v42 = vcombine.low %v195_v30, %v199_v32  ;;  %v2390_v43 = vcombine.high %v59_v36, %v63_v37  ;;  %v51_v44 = vld [vmem:[%s3720_s1 + $0xc8] sm:$0xff] }
  0x37   :  { %v110_v50 = vld [vmem:[%s3720_s1 + $0x2a0] sm:$0xff]  ;;  %1616 = vmatpush2.bf16.msra.mxu0 %v2443_v53  ;;  %v55_v45 = vld [vmem:[%s3720_s1 + $0xe8] sm:$0xff] }
  0x38   :  { %v234_v51 = vld [vmem:[%s3720_s1 + $0x680] sm:$0xff]  ;;  %v2436_v55 = vcombine.high %v106_v49, %v110_v50  ;;  %1656 = vmatprep.subr.bf16.mxu1 %v2572_v48  ;;  %v2435_v63 = vcombine.low %v106_v49, %v110_v50  ;;  %v179_v46 = vld [vmem:[%s3720_s1 + $0x4c8] sm:$0xff]  ;;  %v2518_v48 = vcombine.high %v187_v38, %v191_v40  ;;  %v2389_v50 = vcombine.low %v59_v36, %v63_v37 }
  0x39   :  { %v238_v52 = vld [vmem:[%s3720_s1 + $0x6a0] sm:$0xff]  ;;  %1657 = vmatpush2.bf16.msra.mxu1 %v2571_v54  ;;  %v183_v49 = vld [vmem:[%s3720_s1 + $0x4e8] sm:$0xff] }
  0x3a   :  { %v2564_v57 = vcombine.high %v234_v51, %v238_v52  ;;  %v98_v58 = vld [vmem:[%s3720_s1 + $0x240] sm:$0xff]  ;;  %1617 = vmatprep.subr.bf16.mxu0 %v2436_v55  ;;  %v2563_v0 = vcombine.low %v234_v51, %v238_v52  ;;  %v2517_v51 = vcombine.low %v187_v38, %v191_v40  ;;  %v2382_v52 = vcombine.high %v51_v44, %v55_v45  ;;  %v43_v53 = vld [vmem:[%s3720_s1 + $0x88] sm:$0xff] }
  0x3b   :  { %v102_v60 = vld [vmem:[%s3720_s1 + $0x260] sm:$0xff]  ;;  %1618 = vmatpush2.bf16.msra.mxu0 %v2435_v63  ;;  %v47_v54 = vld [vmem:[%s3720_s1 + $0xa8] sm:$0xff] }
  0x3c   :  { %v226_v61 = vld [vmem:[%s3720_s1 + $0x640] sm:$0xff]  ;;  %v2428_v1 = vcombine.high %v98_v58, %v102_v60  ;;  %1658 = vmatprep.subr.bf16.mxu1 %v2564_v57  ;;  %v2427_v8 = vcombine.low %v98_v58, %v102_v60  ;;  %v171_v55 = vld [vmem:[%s3720_s1 + $0x488] sm:$0xff]  ;;  %v2510_v57 = vcombine.high %v179_v46, %v183_v49  ;;  %v2381_v60 = vcombine.low %v51_v44, %v55_v45 }
  0x3d   :  { %v230_v62 = vld [vmem:[%s3720_s1 + $0x660] sm:$0xff]  ;;  %1659 = vmatpush2.bf16.msra.mxu1 %v2563_v0  ;;  %v175_v58 = vld [vmem:[%s3720_s1 + $0x4a8] sm:$0xff] }
  0x3e   :  { %v2556_v2 = vcombine.high %v226_v61, %v230_v62  ;;  %v90_v4 = vld [vmem:[%s3720_s1 + $0x200] sm:$0xff]  ;;  %1619 = vmatprep.subr.bf16.mxu0 %v2428_v1  ;;  %v2555_v10 = vcombine.low %v226_v61, %v230_v62  ;;  %v2509_v61 = vcombine.low %v179_v46, %v183_v49  ;;  %v2374_v62 = vcombine.high %v43_v53, %v47_v54  ;;  %v35_v63 = vld [vmem:[%s3720_s1 + $0x48] sm:$0xff] }
  0x3f   :  { %v94_v5 = vld [vmem:[%s3720_s1 + $0x220] sm:$0xff]  ;;  %1620 = vmatpush2.bf16.msra.mxu0 %v2427_v8  ;;  %v39_v0 = vld [vmem:[%s3720_s1 + $0x68] sm:$0xff] }
  0x40   :  { %v218_v6 = vld [vmem:[%s3720_s1 + $0x600] sm:$0xff]  ;;  %v2420_v11 = vcombine.high %v90_v4, %v94_v5  ;;  %1660 = vmatprep.subr.bf16.mxu1 %v2556_v2  ;;  %v2419_v17 = vcombine.low %v90_v4, %v94_v5  ;;  %v163_v1 = vld [vmem:[%s3720_s1 + $0x448] sm:$0xff]  ;;  %v2502_v2 = vcombine.high %v171_v55, %v175_v58  ;;  %v2373_v5 = vcombine.low %v43_v53, %v47_v54 }
  0x41   :  { %v222_v7 = vld [vmem:[%s3720_s1 + $0x620] sm:$0xff]  ;;  %1661 = vmatpush2.bf16.msra.mxu1 %v2555_v10  ;;  %v167_v4 = vld [vmem:[%s3720_s1 + $0x468] sm:$0xff]  ;;  %v2365_v14 = vcombine.low %v35_v63, %v39_v0 }
  0x42   :  { %v2548_v12 = vcombine.high %v218_v6, %v222_v7  ;;  %1621 = vmatprep.subr.bf16.mxu0 %v2420_v11  ;;  %v2547_v19 = vcombine.low %v218_v6, %v222_v7  ;;  %v2501_v6 = vcombine.low %v171_v55, %v175_v58  ;;  %v2366_v7 = vcombine.high %v35_v63, %v39_v0  ;;  %v27_v8 = vld [vmem:[%s3720_s1 + $0x8] sm:$0xff] }
  0x43   :  { %1622 = vmatpush2.bf16.msra.mxu0 %v2419_v17  ;;  %v31_v10 = vld [vmem:[%s3720_s1 + $0x28] sm:$0xff]  ;;  %v2493_v15 = vcombine.low %v163_v1, %v167_v4 }
  0x44   :  { %1662 = vmatprep.subr.bf16.mxu1 %v2548_v12  ;;  %1673 = vmatprep.subr.bf16.mxu0 %v2414_v20  ;;  %v155_v11 = vld [vmem:[%s3720_s1 + $0x408] sm:$0xff]  ;;  %v2494_v12 = vcombine.high %v163_v1, %v167_v4  ;;  %v2358_v16 = vcombine.high %v27_v8, %v31_v10  ;;  %v2357_v23 = vcombine.low %v27_v8, %v31_v10 }
  0x45   :  { %1663 = vmatpush2.bf16.msra.mxu1 %v2547_v19  ;;  %v159_v13 = vld [vmem:[%s3720_s1 + $0x428] sm:$0xff] }
  0x46   :  { %1714 = vmatprep.subr.bf16.mxu1 %v2542_v21  ;;  %1624 = vmatmul.mubr.bf16.vlgmr.msra.gmra.mxu0 %v3009_v18  ;;  %v147_v17 = vld [vmem:[%s3720_s1 + $0x3c8] sm:$0xff]  ;;  %v2486_v21 = vcombine.high %v155_v11, %v159_v13  ;;  %v2485_v24 = vcombine.low %v155_v11, %v159_v13 }
  0x47   :  { %1674 = vmatpush1.bf16.msra.mxu0 %v2413_v25  ;;  %1705 = vmatprep.mubr.bf16.mxu0 %v2891_v3  ;;  %v151_v19 = vld [vmem:[%s3720_s1 + $0x3e8] sm:$0xff] }
  0x48   :  { %1665 = vmatmul.mubr.bf16.vlgmr.msra.gmra.mxu1 %v3025_v59  ;;  %1675 = vmatprep.subr.bf16.mxu0 %v2406_v27  ;;  %v275_v20 = vld [vmem:[%s3720_s1 + $0x7c8] sm:$0xff]  ;;  %v2478_v56 = vcombine.high %v147_v17, %v151_v19  ;;  %v2477_v30 = vcombine.low %v147_v17, %v151_v19 }
  0x49   :  { %1715 = vmatpush1.bf16.msra.mxu1 %v2541_v26  ;;  %1746 = vmatprep.mubr.bf16.mxu1 %v2902_v9  ;;  %v279_v22 = vld [vmem:[%s3720_s1 + $0x7e8] sm:$0xff] }
  0x4a   :  { %1716 = vmatprep.subr.bf16.mxu1 %v2534_v31  ;;  %v139_v25 = vld [vmem:[%s3720_s1 + $0x388] sm:$0xff]  ;;  %v2606_v28 = vcombine.high %v275_v20, %v279_v22 }
  0x4b   :  { %1676 = vmatpush1.bf16.msra.mxu0 %v2405_v33  ;;  %v143_v26 = vld [vmem:[%s3720_s1 + $0x3a8] sm:$0xff] }
  0x4c   :  { %1677 = vmatprep.subr.bf16.mxu0 %v2398_v35  ;;  %v267_v27 = vld [vmem:[%s3720_s1 + $0x788] sm:$0xff] }
  0x4d   :  { %1717 = vmatpush1.bf16.msra.mxu1 %v2533_v34  ;;  %v271_v29 = vld [vmem:[%s3720_s1 + $0x7a8] sm:$0xff] }
  0x4e   :  { %1718 = vmatprep.subr.bf16.mxu1 %v2526_v39 }
  0x4f   :  { %1678 = vmatpush1.bf16.msra.mxu0 %v2397_v41 }
  0x50   :  { %1679 = vmatprep.subr.bf16.mxu0 %v2390_v43 }
  0x51   :  { %1719 = vmatpush1.bf16.msra.mxu1 %v2525_v42 }
  0x52   :  { %1720 = vmatprep.subr.bf16.mxu1 %v2518_v48 }
  0x53   :  { %1680 = vmatpush1.bf16.msra.mxu0 %v2389_v50 }
  0x54   :  { %1681 = vmatprep.subr.bf16.mxu0 %v2382_v52 }
  0x55   :  { %1721 = vmatpush1.bf16.msra.mxu1 %v2517_v51 }
  0x56   :  { %1722 = vmatprep.subr.bf16.mxu1 %v2510_v57 }
  0x57   :  { %1682 = vmatpush1.bf16.msra.mxu0 %v2381_v60 }
  0x58   :  { %1683 = vmatprep.subr.bf16.mxu0 %v2374_v62 }
  0x59   :  { %1723 = vmatpush1.bf16.msra.mxu1 %v2509_v61 }
  0x5a   :  { %1724 = vmatprep.subr.bf16.mxu1 %v2502_v2 }
  0x5b   :  { %1684 = vmatpush1.bf16.msra.mxu0 %v2373_v5 }
  0x5c   :  { %1685 = vmatprep.subr.bf16.mxu0 %v2366_v7 }
  0x5d   :  { %1725 = vmatpush1.bf16.msra.mxu1 %v2501_v6 }
  0x5e   :  { %1726 = vmatprep.subr.bf16.mxu1 %v2494_v12 }
  0x5f   :  { %1686 = vmatpush1.bf16.msra.mxu0 %v2365_v14 }
  0x60   :  { %1687 = vmatprep.subr.bf16.mxu0 %v2358_v16 }
  0x61   :  { %1727 = vmatpush1.bf16.msra.mxu1 %v2493_v15 }
  0x62   :  { %1728 = vmatprep.subr.bf16.mxu1 %v2486_v21 }
  0x63   :  { %1688 = vmatpush1.bf16.msra.mxu0 %v2357_v23 }
  0x64   :  { %9 = vsyncpa [#allocation4], 0  ;;  %1689 = vmatprep.subr.bf16.mxu0 %v2478_v56  ;;  %v2605_v31 = vcombine.low %v275_v20, %v279_v22  ;;  %v2470_v32 = vcombine.high %v139_v25, %v143_v26  ;;  %v2598_v33 = vcombine.high %v267_v27, %v271_v29  ;;  %v131_v34 = vld [vmem:[%s3720_s1 + $0x348] sm:$0xff]  ;;  %v2469_v38 = vcombine.low %v139_v25, %v143_v26  ;;  %v88_v56 = vld [vmem:[%s3720_s1 + $0x1f0] sm:$0xff] }
  0x65   :  { %1729 = vmatpush1.bf16.msra.mxu1 %v2485_v24  ;;  %v135_v35 = vld [vmem:[%s3720_s1 + $0x368] sm:$0xff]  ;;  %v2597_v39 = vcombine.low %v267_v27, %v271_v29  ;;  %v84_v24 = vld [vmem:[%s3720_s1 + $0x1d0] sm:$0xff]  ;;  %vm23_vm0 = vcmask 254976  }
  0x66   :  { %1730 = vmatprep.subr.bf16.mxu1 %v2606_v28  ;;  %v259_v36 = vld [vmem:[%s3720_s1 + $0x748] sm:$0xff]  ;;  %v2462_v40 = vcombine.high %v131_v34, %v135_v35  ;;  %v2461_v46 = vcombine.low %v131_v34, %v135_v35  ;;  %v212_v25 = vld [vmem:[%s3720_s1 + $0x5d0] sm:$0xff]  ;;  %v2416_v29 = vcombine.high %v84_v24, %v88_v56  ;;  %v2415_v35 = vcombine.low %v84_v24, %v88_v56 }
  0x67   :  { %v263_v37 = vld [vmem:[%s3720_s1 + $0x768] sm:$0xff]  ;;  %1690 = vmatpush2.bf16.msra.mxu0 %v2477_v30  ;;  %v216_v26 = vld [vmem:[%s3720_s1 + $0x5f0] sm:$0xff] }
  0x68   :  { %1691 = vmatprep.subr.bf16.mxu0 %v2470_v32  ;;  %v2590_v41 = vcombine.high %v259_v36, %v263_v37  ;;  %v123_v42 = vld [vmem:[%s3720_s1 + $0x308] sm:$0xff]  ;;  %v2589_v48 = vcombine.low %v259_v36, %v263_v37  ;;  %v2544_v30 = vcombine.high %v212_v25, %v216_v26  ;;  %v80_v32 = vld [vmem:[%s3720_s1 + $0x1b0] sm:$0xff]  ;;  %v2543_v36 = vcombine.low %v212_v25, %v216_v26 }
  0x69   :  { %1731 = vmatpush2.bf16.msra.mxu1 %v2605_v31  ;;  %v127_v43 = vld [vmem:[%s3720_s1 + $0x328] sm:$0xff]  ;;  %v76_v31 = vld [vmem:[%s3720_s1 + $0x190] sm:$0xff] }
  0x6a   :  { %1732 = vmatprep.subr.bf16.mxu1 %v2598_v33  ;;  %v251_v44 = vld [vmem:[%s3720_s1 + $0x708] sm:$0xff]  ;;  %v2454_v49 = vcombine.high %v123_v42, %v127_v43  ;;  %v2453_v55 = vcombine.low %v123_v42, %v127_v43  ;;  %v204_v33 = vld [vmem:[%s3720_s1 + $0x590] sm:$0xff]  ;;  %v2408_v37 = vcombine.high %v76_v31, %v80_v32  ;;  %v2407_v43 = vcombine.low %v76_v31, %v80_v32 }
  0x6b   :  { %v255_v45 = vld [vmem:[%s3720_s1 + $0x728] sm:$0xff]  ;;  %1692 = vmatpush2.bf16.msra.mxu0 %v2469_v38  ;;  %v208_v34 = vld [vmem:[%s3720_s1 + $0x5b0] sm:$0xff] }
  0x6c   :  { %1693 = vmatprep.subr.bf16.mxu0 %v2462_v40  ;;  %v2582_v50 = vcombine.high %v251_v44, %v255_v45  ;;  %v115_v51 = vld [vmem:[%s3720_s1 + $0x2c8] sm:$0xff]  ;;  %v2581_v57 = vcombine.low %v251_v44, %v255_v45  ;;  %v2536_v38 = vcombine.high %v204_v33, %v208_v34  ;;  %v72_v40 = vld [vmem:[%s3720_s1 + $0x170] sm:$0xff]  ;;  %v2535_v44 = vcombine.low %v204_v33, %v208_v34 }
  0x6d   :  { %1733 = vmatpush2.bf16.msra.mxu1 %v2597_v39  ;;  %v119_v52 = vld [vmem:[%s3720_s1 + $0x2e8] sm:$0xff]  ;;  %v68_v39 = vld [vmem:[%s3720_s1 + $0x150] sm:$0xff] }
  0x6e   :  { %1734 = vmatprep.subr.bf16.mxu1 %v2590_v41  ;;  %v243_v53 = vld [vmem:[%s3720_s1 + $0x6c8] sm:$0xff]  ;;  %v2446_v58 = vcombine.high %v115_v51, %v119_v52  ;;  %v2445_v1 = vcombine.low %v115_v51, %v119_v52  ;;  %v196_v41 = vld [vmem:[%s3720_s1 + $0x550] sm:$0xff]  ;;  %v2400_v45 = vcombine.high %v68_v39, %v72_v40  ;;  %v2399_v52 = vcombine.low %v68_v39, %v72_v40 }
  0x6f   :  { %v247_v54 = vld [vmem:[%s3720_s1 + $0x6e8] sm:$0xff]  ;;  %1694 = vmatpush2.bf16.msra.mxu0 %v2461_v46  ;;  %v200_v42 = vld [vmem:[%s3720_s1 + $0x570] sm:$0xff] }
  0x70   :  { %1695 = vmatprep.subr.bf16.mxu0 %v2454_v49  ;;  %v2574_v60 = vcombine.high %v243_v53, %v247_v54  ;;  %v107_v61 = vld [vmem:[%s3720_s1 + $0x288] sm:$0xff]  ;;  %v2573_v2 = vcombine.low %v243_v53, %v247_v54  ;;  %v2528_v46 = vcombine.high %v196_v41, %v200_v42  ;;  %v64_v49 = vld [vmem:[%s3720_s1 + $0x130] sm:$0xff]  ;;  %v2527_v53 = vcombine.low %v196_v41, %v200_v42 }
  0x71   :  { %1735 = vmatpush2.bf16.msra.mxu1 %v2589_v48  ;;  %v111_v62 = vld [vmem:[%s3720_s1 + $0x2a8] sm:$0xff]  ;;  %v60_v48 = vld [vmem:[%s3720_s1 + $0x110] sm:$0xff] }
  0x72   :  { %1736 = vmatprep.subr.bf16.mxu1 %v2582_v50  ;;  %v235_v63 = vld [vmem:[%s3720_s1 + $0x688] sm:$0xff]  ;;  %v2438_v4 = vcombine.high %v107_v61, %v111_v62  ;;  %v2437_v11 = vcombine.low %v107_v61, %v111_v62  ;;  %v188_v50 = vld [vmem:[%s3720_s1 + $0x510] sm:$0xff]  ;;  %v2392_v54 = vcombine.high %v60_v48, %v64_v49  ;;  %v2391_v62 = vcombine.low %v60_v48, %v64_v49 }
  0x73   :  { %v239_v0 = vld [vmem:[%s3720_s1 + $0x6a8] sm:$0xff]  ;;  %1696 = vmatpush2.bf16.msra.mxu0 %v2453_v55  ;;  %v192_v51 = vld [vmem:[%s3720_s1 + $0x530] sm:$0xff] }
  0x74   :  { %1697 = vmatprep.subr.bf16.mxu0 %v2446_v58  ;;  %v2566_v5 = vcombine.high %v235_v63, %v239_v0  ;;  %v99_v6 = vld [vmem:[%s3720_s1 + $0x248] sm:$0xff]  ;;  %v2565_v12 = vcombine.low %v235_v63, %v239_v0  ;;  %v2520_v55 = vcombine.high %v188_v50, %v192_v51  ;;  %v56_v58 = vld [vmem:[%s3720_s1 + $0xf0] sm:$0xff]  ;;  %v2519_v63 = vcombine.low %v188_v50, %v192_v51 }
  0x75   :  { %1737 = vmatpush2.bf16.msra.mxu1 %v2581_v57  ;;  %v103_v7 = vld [vmem:[%s3720_s1 + $0x268] sm:$0xff]  ;;  %v52_v57 = vld [vmem:[%s3720_s1 + $0xd0] sm:$0xff] }
  0x76   :  { %1738 = vmatprep.subr.bf16.mxu1 %v2574_v60  ;;  %v227_v8 = vld [vmem:[%s3720_s1 + $0x648] sm:$0xff]  ;;  %v2430_v13 = vcombine.high %v99_v6, %v103_v7  ;;  %v2429_v20 = vcombine.low %v99_v6, %v103_v7  ;;  %v180_v60 = vld [vmem:[%s3720_s1 + $0x4d0] sm:$0xff]  ;;  %v2384_v0 = vcombine.high %v52_v57, %v56_v58  ;;  %v2383_v7 = vcombine.low %v52_v57, %v56_v58 }
  0x77   :  { %v231_v10 = vld [vmem:[%s3720_s1 + $0x668] sm:$0xff]  ;;  %1698 = vmatpush2.bf16.msra.mxu0 %v2445_v1  ;;  %v184_v61 = vld [vmem:[%s3720_s1 + $0x4f0] sm:$0xff] }
  0x78   :  { %1699 = vmatprep.subr.bf16.mxu0 %v2438_v4  ;;  %v2558_v14 = vcombine.high %v227_v8, %v231_v10  ;;  %v91_v15 = vld [vmem:[%s3720_s1 + $0x208] sm:$0xff]  ;;  %v2557_v21 = vcombine.low %v227_v8, %v231_v10  ;;  %v2512_v1 = vcombine.high %v180_v60, %v184_v61  ;;  %v48_v4 = vld [vmem:[%s3720_s1 + $0xb0] sm:$0xff]  ;;  %v2511_v8 = vcombine.low %v180_v60, %v184_v61 }
  0x79   :  { %1739 = vmatpush2.bf16.msra.mxu1 %v2573_v2  ;;  %v95_v16 = vld [vmem:[%s3720_s1 + $0x228] sm:$0xff]  ;;  %v44_v2 = vld [vmem:[%s3720_s1 + $0x90] sm:$0xff] }
  0x7a   :  { %1740 = vmatprep.subr.bf16.mxu1 %v2566_v5  ;;  %v219_v17 = vld [vmem:[%s3720_s1 + $0x608] sm:$0xff]  ;;  %v2422_v22 = vcombine.high %v91_v15, %v95_v16  ;;  %v2421_v27 = vcombine.low %v91_v15, %v95_v16  ;;  %v172_v5 = vld [vmem:[%s3720_s1 + $0x490] sm:$0xff]  ;;  %v2376_v10 = vcombine.high %v44_v2, %v48_v4  ;;  %v2375_v16 = vcombine.low %v44_v2, %v48_v4 }
  0x7b   :  { %v223_v19 = vld [vmem:[%s3720_s1 + $0x628] sm:$0xff]  ;;  %1700 = vmatpush2.bf16.msra.mxu0 %v2437_v11  ;;  %v176_v6 = vld [vmem:[%s3720_s1 + $0x4b0] sm:$0xff] }
  0x7c   :  { %1701 = vmatprep.subr.bf16.mxu0 %v2430_v13  ;;  %v2550_v23 = vcombine.high %v219_v17, %v223_v19  ;;  %v2549_v28 = vcombine.low %v219_v17, %v223_v19  ;;  %v2504_v11 = vcombine.high %v172_v5, %v176_v6  ;;  %v40_v13 = vld [vmem:[%s3720_s1 + $0x70] sm:$0xff]  ;;  %v2503_v17 = vcombine.low %v172_v5, %v176_v6 }
  0x7d   :  { %1741 = vmatpush2.bf16.msra.mxu1 %v2565_v12  ;;  %v36_v12 = vld [vmem:[%s3720_s1 + $0x50] sm:$0xff] }
  0x7e   :  { %1742 = vmatprep.subr.bf16.mxu1 %v2558_v14  ;;  %v164_v14 = vld [vmem:[%s3720_s1 + $0x450] sm:$0xff]  ;;  %v2368_v19 = vcombine.high %v36_v12, %v40_v13  ;;  %v2367_v56 = vcombine.low %v36_v12, %v40_v13 }
  0x7f   :  { %1702 = vmatpush2.bf16.msra.mxu0 %v2429_v20  ;;  %v168_v15 = vld [vmem:[%s3720_s1 + $0x470] sm:$0xff] }
  0x80   :  { %1703 = vmatprep.subr.bf16.mxu0 %v2422_v22  ;;  %v2496_v20 = vcombine.high %v164_v14, %v168_v15  ;;  %v32_v22 = vld [vmem:[%s3720_s1 + $0x30] sm:$0xff]  ;;  %v2495_v25 = vcombine.low %v164_v14, %v168_v15 }
  0x81   :  { %1743 = vmatpush2.bf16.msra.mxu1 %v2557_v21  ;;  %v28_v21 = vld [vmem:[%s3720_s1 + $0x10] sm:$0xff] }
  0x82   :  { %1744 = vmatprep.subr.bf16.mxu1 %v2550_v23  ;;  %v156_v23 = vld [vmem:[%s3720_s1 + $0x410] sm:$0xff]  ;;  %v2360_v26 = vcombine.high %v28_v21, %v32_v22  ;;  %v2359_v32 = vcombine.low %v28_v21, %v32_v22 }
  0x83   :  { %1704 = vmatpush2.bf16.msra.mxu0 %v2421_v27  ;;  %v160_v24 = vld [vmem:[%s3720_s1 + $0x430] sm:$0xff] }
  0x84   :  { %1755 = vmatprep.subr.bf16.mxu0 %v2416_v29  ;;  %v2488_v27 = vcombine.high %v156_v23, %v160_v24  ;;  %v152_v29 = vld [vmem:[%s3720_s1 + $0x3f0] sm:$0xff]  ;;  %v2487_v33 = vcombine.low %v156_v23, %v160_v24 }
  0x85   :  { %1745 = vmatpush2.bf16.msra.mxu1 %v2549_v28  ;;  %v148_v28 = vld [vmem:[%s3720_s1 + $0x3d0] sm:$0xff] }
  0x86   :  { %1796 = vmatprep.subr.bf16.mxu1 %v2544_v30  ;;  %1706 = vmatmul.mubr.bf16.vlgmr.msra.gmra.mxu0 %v3009_v18  ;;  %v276_v30 = vld [vmem:[%s3720_s1 + $0x7d0] sm:$0xff]  ;;  %v2480_v34 = vcombine.high %v148_v28, %v152_v29  ;;  %v2479_v40 = vcombine.low %v148_v28, %v152_v29 }
  0x87   :  { %1756 = vmatpush1.bf16.msra.mxu0 %v2415_v35  ;;  %1787 = vmatprep.mubr.bf16.mxu0 %v2891_v3  ;;  %v280_v31 = vld [vmem:[%s3720_s1 + $0x7f0] sm:$0xff] }
  0x88   :  { %1747 = vmatmul.mubr.bf16.vlgmr.msra.gmra.mxu1 %v3025_v59  ;;  %1757 = vmatprep.subr.bf16.mxu0 %v2408_v37  ;;  %v2608_v35 = vcombine.high %v276_v30, %v280_v31  ;;  %v144_v37 = vld [vmem:[%s3720_s1 + $0x3b0] sm:$0xff]  ;;  %v2607_v41 = vcombine.low %v276_v30, %v280_v31 }
  0x89   :  { %1797 = vmatpush1.bf16.msra.mxu1 %v2543_v36  ;;  %1828 = vmatprep.mubr.bf16.mxu1 %v2902_v9  ;;  %v140_v36 = vld [vmem:[%s3720_s1 + $0x390] sm:$0xff] }
  0x8a   :  { %1798 = vmatprep.subr.bf16.mxu1 %v2536_v38  ;;  %v268_v38 = vld [vmem:[%s3720_s1 + $0x790] sm:$0xff]  ;;  %v2472_v42 = vcombine.high %v140_v36, %v144_v37  ;;  %v2471_v49 = vcombine.low %v140_v36, %v144_v37  ;;  %v217_v36 = vld [vmem:[%s3720_s1 + $0x5f8] sm:$0xff] }
  0x8b   :  { %1758 = vmatpush1.bf16.msra.mxu0 %v2407_v43  ;;  %v272_v39 = vld [vmem:[%s3720_s1 + $0x7b0] sm:$0xff] }
  0x8c   :  { %1759 = vmatprep.subr.bf16.mxu0 %v2400_v45  ;;  %v2600_v43 = vcombine.high %v268_v38, %v272_v39  ;;  %v136_v45 = vld [vmem:[%s3720_s1 + $0x370] sm:$0xff]  ;;  %v2599_v50 = vcombine.low %v268_v38, %v272_v39 }
  0x8d   :  { %1799 = vmatpush1.bf16.msra.mxu1 %v2535_v44  ;;  %v132_v44 = vld [vmem:[%s3720_s1 + $0x350] sm:$0xff] }
  0x8e   :  { %1800 = vmatprep.subr.bf16.mxu1 %v2528_v46  ;;  %v260_v46 = vld [vmem:[%s3720_s1 + $0x750] sm:$0xff]  ;;  %v2464_v51 = vcombine.high %v132_v44, %v136_v45  ;;  %v2463_v58 = vcombine.low %v132_v44, %v136_v45  ;;  %v209_v44 = vld [vmem:[%s3720_s1 + $0x5b8] sm:$0xff] }
  0x8f   :  { %1760 = vmatpush1.bf16.msra.mxu0 %v2399_v52  ;;  %v264_v48 = vld [vmem:[%s3720_s1 + $0x770] sm:$0xff] }
  0x90   :  { %1761 = vmatprep.subr.bf16.mxu0 %v2392_v54  ;;  %v2592_v52 = vcombine.high %v260_v46, %v264_v48  ;;  %v128_v54 = vld [vmem:[%s3720_s1 + $0x330] sm:$0xff]  ;;  %v2591_v60 = vcombine.low %v260_v46, %v264_v48 }
  0x91   :  { %1801 = vmatpush1.bf16.msra.mxu1 %v2527_v53  ;;  %v124_v53 = vld [vmem:[%s3720_s1 + $0x310] sm:$0xff] }
  0x92   :  { %1802 = vmatprep.subr.bf16.mxu1 %v2520_v55  ;;  %v252_v55 = vld [vmem:[%s3720_s1 + $0x710] sm:$0xff]  ;;  %v2456_v61 = vcombine.high %v124_v53, %v128_v54  ;;  %v2455_v4 = vcombine.low %v124_v53, %v128_v54  ;;  %v201_v53 = vld [vmem:[%s3720_s1 + $0x578] sm:$0xff] }
  0x93   :  { %1762 = vmatpush1.bf16.msra.mxu0 %v2391_v62  ;;  %v256_v57 = vld [vmem:[%s3720_s1 + $0x730] sm:$0xff] }
  0x94   :  { %1763 = vmatprep.subr.bf16.mxu0 %v2384_v0  ;;  %v2584_v62 = vcombine.high %v252_v55, %v256_v57  ;;  %v120_v0 = vld [vmem:[%s3720_s1 + $0x2f0] sm:$0xff]  ;;  %v2583_v5 = vcombine.low %v252_v55, %v256_v57 }
  0x95   :  { %1803 = vmatpush1.bf16.msra.mxu1 %v2519_v63  ;;  %v116_v63 = vld [vmem:[%s3720_s1 + $0x2d0] sm:$0xff] }
  0x96   :  { %1804 = vmatprep.subr.bf16.mxu1 %v2512_v1  ;;  %v244_v1 = vld [vmem:[%s3720_s1 + $0x6d0] sm:$0xff]  ;;  %v2448_v6 = vcombine.high %v116_v63, %v120_v0  ;;  %v2447_v13 = vcombine.low %v116_v63, %v120_v0  ;;  %v193_v63 = vld [vmem:[%s3720_s1 + $0x538] sm:$0xff] }
  0x97   :  { %1764 = vmatpush1.bf16.msra.mxu0 %v2383_v7  ;;  %v248_v2 = vld [vmem:[%s3720_s1 + $0x6f0] sm:$0xff] }
  0x98   :  { %1765 = vmatprep.subr.bf16.mxu0 %v2376_v10  ;;  %v2576_v7 = vcombine.high %v244_v1, %v248_v2  ;;  %v112_v10 = vld [vmem:[%s3720_s1 + $0x2b0] sm:$0xff]  ;;  %v2575_v14 = vcombine.low %v244_v1, %v248_v2 }
  0x99   :  { %1805 = vmatpush1.bf16.msra.mxu1 %v2511_v8  ;;  %v108_v8 = vld [vmem:[%s3720_s1 + $0x290] sm:$0xff] }
  0x9a   :  { %1806 = vmatprep.subr.bf16.mxu1 %v2504_v11  ;;  %v236_v11 = vld [vmem:[%s3720_s1 + $0x690] sm:$0xff]  ;;  %v2440_v15 = vcombine.high %v108_v8, %v112_v10  ;;  %v2439_v22 = vcombine.low %v108_v8, %v112_v10 }
  0x9b   :  { %1766 = vmatpush1.bf16.msra.mxu0 %v2375_v16  ;;  %v240_v12 = vld [vmem:[%s3720_s1 + $0x6b0] sm:$0xff] }
  0x9c   :  { %1767 = vmatprep.subr.bf16.mxu0 %v2368_v19  ;;  %v2568_v16 = vcombine.high %v236_v11, %v240_v12  ;;  %v104_v19 = vld [vmem:[%s3720_s1 + $0x270] sm:$0xff]  ;;  %v2567_v23 = vcombine.low %v236_v11, %v240_v12  ;;  %v45_v12 = vld [vmem:[%s3720_s1 + $0x98] sm:$0xff] }
  0x9d   :  { %1807 = vmatpush1.bf16.msra.mxu1 %v2503_v17  ;;  %v100_v17 = vld [vmem:[%s3720_s1 + $0x250] sm:$0xff] }
  0x9e   :  { %1808 = vmatprep.subr.bf16.mxu1 %v2496_v20  ;;  %v228_v20 = vld [vmem:[%s3720_s1 + $0x650] sm:$0xff]  ;;  %v2432_v24 = vcombine.high %v100_v17, %v104_v19  ;;  %v2431_v29 = vcombine.low %v100_v17, %v104_v19 }
  0x9f   :  { %1768 = vmatpush1.bf16.msra.mxu0 %v2367_v56  ;;  %v232_v21 = vld [vmem:[%s3720_s1 + $0x670] sm:$0xff] }
  0xa0   :  { %1769 = vmatprep.subr.bf16.mxu0 %v2360_v26  ;;  %v2560_v56 = vcombine.high %v228_v20, %v232_v21  ;;  %v96_v26 = vld [vmem:[%s3720_s1 + $0x230] sm:$0xff]  ;;  %v2559_v30 = vcombine.low %v228_v20, %v232_v21  ;;  %v37_v21 = vld [vmem:[%s3720_s1 + $0x58] sm:$0xff] }
  0xa1   :  { %1809 = vmatpush1.bf16.msra.mxu1 %v2495_v25  ;;  %v92_v25 = vld [vmem:[%s3720_s1 + $0x210] sm:$0xff] }
  0xa2   :  { %1810 = vmatprep.subr.bf16.mxu1 %v2488_v27  ;;  %v220_v27 = vld [vmem:[%s3720_s1 + $0x610] sm:$0xff]  ;;  %v2424_v31 = vcombine.high %v92_v25, %v96_v26  ;;  %v2423_v37 = vcombine.low %v92_v25, %v96_v26 }
  0xa3   :  { %1770 = vmatpush1.bf16.msra.mxu0 %v2359_v32  ;;  %v224_v28 = vld [vmem:[%s3720_s1 + $0x630] sm:$0xff] }
  0xa4   :  { %1771 = vmatprep.subr.bf16.mxu0 %v2480_v34  ;;  %v2552_v32 = vcombine.high %v220_v27, %v224_v28  ;;  %v89_v34 = vld [vmem:[%s3720_s1 + $0x1f8] sm:$0xff]  ;;  %v2551_v38 = vcombine.low %v220_v27, %v224_v28 }
  0xa5   :  { %1811 = vmatpush1.bf16.msra.mxu1 %v2487_v33  ;;  %v85_v33 = vld [vmem:[%s3720_s1 + $0x1d8] sm:$0xff] }
  0xa6   :  { %1812 = vmatprep.subr.bf16.mxu1 %v2608_v35  ;;  %v213_v35 = vld [vmem:[%s3720_s1 + $0x5d8] sm:$0xff]  ;;  %v2418_v39 = vcombine.high %v85_v33, %v89_v34  ;;  %v2417_v45 = vcombine.low %v85_v33, %v89_v34 }
  0xa7   :  { %1772 = vmatpush2.bf16.msra.mxu0 %v2479_v40  ;;  %v2546_v40 = vcombine.high %v213_v35, %v217_v36  ;;  %v2545_v46 = vcombine.low %v213_v35, %v217_v36  ;;  %v29_v28 = vld [vmem:[%s3720_s1 + $0x18] sm:$0xff] }
  0xa8   :  { %1773 = vmatprep.subr.bf16.mxu0 %v2472_v42  ;;  %v81_v42 = vld [vmem:[%s3720_s1 + $0x1b8] sm:$0xff] }
  0xa9   :  { %1813 = vmatpush2.bf16.msra.mxu1 %v2607_v41  ;;  %v77_v41 = vld [vmem:[%s3720_s1 + $0x198] sm:$0xff] }
  0xaa   :  { %1814 = vmatprep.subr.bf16.mxu1 %v2600_v43  ;;  %v205_v43 = vld [vmem:[%s3720_s1 + $0x598] sm:$0xff]  ;;  %v2410_v48 = vcombine.high %v77_v41, %v81_v42  ;;  %v2409_v54 = vcombine.low %v77_v41, %v81_v42 }
  0xab   :  { %1774 = vmatpush2.bf16.msra.mxu0 %v2471_v49  ;;  %v2538_v49 = vcombine.high %v205_v43, %v209_v44  ;;  %v2537_v55 = vcombine.low %v205_v43, %v209_v44  ;;  %v149_v36 = vld [vmem:[%s3720_s1 + $0x3d8] sm:$0xff] }
  0xac   :  { %1775 = vmatprep.subr.bf16.mxu0 %v2464_v51  ;;  %v73_v51 = vld [vmem:[%s3720_s1 + $0x178] sm:$0xff] }
  0xad   :  { %1815 = vmatpush2.bf16.msra.mxu1 %v2599_v50  ;;  %v69_v50 = vld [vmem:[%s3720_s1 + $0x158] sm:$0xff] }
  0xae   :  { %1816 = vmatprep.subr.bf16.mxu1 %v2592_v52  ;;  %v197_v52 = vld [vmem:[%s3720_s1 + $0x558] sm:$0xff]  ;;  %v2402_v57 = vcombine.high %v69_v50, %v73_v51  ;;  %v2401_v0 = vcombine.low %v69_v50, %v73_v51 }
  0xaf   :  { %1776 = vmatpush2.bf16.msra.mxu0 %v2463_v58  ;;  %v2530_v58 = vcombine.high %v197_v52, %v201_v53  ;;  %v2529_v1 = vcombine.low %v197_v52, %v201_v53  ;;  %v141_v44 = vld [vmem:[%s3720_s1 + $0x398] sm:$0xff] }
  0xb0   :  { %1777 = vmatprep.subr.bf16.mxu0 %v2456_v61  ;;  %v65_v61 = vld [vmem:[%s3720_s1 + $0x138] sm:$0xff] }
  0xb1   :  { %1817 = vmatpush2.bf16.msra.mxu1 %v2591_v60  ;;  %v61_v60 = vld [vmem:[%s3720_s1 + $0x118] sm:$0xff] }
  0xb2   :  { %1818 = vmatprep.subr.bf16.mxu1 %v2584_v62  ;;  %v189_v62 = vld [vmem:[%s3720_s1 + $0x518] sm:$0xff]  ;;  %v2394_v2 = vcombine.high %v61_v60, %v65_v61 }
  0xb3   :  { %1778 = vmatpush2.bf16.msra.mxu0 %v2455_v4  ;;  %v2522_v4 = vcombine.high %v189_v62, %v193_v63  ;;  %v2521_v8 = vcombine.low %v189_v62, %v193_v63  ;;  %v133_v53 = vld [vmem:[%s3720_s1 + $0x358] sm:$0xff] }
  0xb4   :  { %1779 = vmatprep.subr.bf16.mxu0 %v2448_v6  ;;  %v185_v6 = vld [vmem:[%s3720_s1 + $0x4f8] sm:$0xff] }
  0xb5   :  { %1819 = vmatpush2.bf16.msra.mxu1 %v2583_v5  ;;  %v57_v5 = vld [vmem:[%s3720_s1 + $0xf8] sm:$0xff] }
  0xb6   :  { %1820 = vmatprep.subr.bf16.mxu1 %v2576_v7  ;;  %v2393_v7 = vcombine.low %v61_v60, %v65_v61  ;;  %v125_v63 = vld [vmem:[%s3720_s1 + $0x318] sm:$0xff] }
  0xb7   :  { %1780 = vmatpush2.bf16.msra.mxu0 %v2447_v13  ;;  %v49_v13 = vld [vmem:[%s3720_s1 + $0xb8] sm:$0xff] }
  0xb8   :  { %1781 = vmatprep.subr.bf16.mxu0 %v2440_v15  ;;  %v177_v15 = vld [vmem:[%s3720_s1 + $0x4b8] sm:$0xff]  ;;  %v2378_v19 = vcombine.high %v45_v12, %v49_v13 }
  0xb9   :  { %1821 = vmatpush2.bf16.msra.mxu1 %v2575_v14  ;;  %v173_v14 = vld [vmem:[%s3720_s1 + $0x498] sm:$0xff] }
  0xba   :  { %1822 = vmatprep.subr.bf16.mxu1 %v2568_v16  ;;  %v2506_v20 = vcombine.high %v173_v14, %v177_v15  ;;  %v2505_v25 = vcombine.low %v173_v14, %v177_v15  ;;  %v109_v15 = vld [vmem:[%s3720_s1 + $0x298] sm:$0xff] }
  0xbb   :  { %1782 = vmatpush2.bf16.msra.mxu0 %v2439_v22  ;;  %v41_v22 = vld [vmem:[%s3720_s1 + $0x78] sm:$0xff] }
  0xbc   :  { %1783 = vmatprep.subr.bf16.mxu0 %v2432_v24  ;;  %v169_v24 = vld [vmem:[%s3720_s1 + $0x478] sm:$0xff]  ;;  %v2370_v26 = vcombine.high %v37_v21, %v41_v22 }
  0xbd   :  { %1823 = vmatpush2.bf16.msra.mxu1 %v2567_v23  ;;  %v165_v23 = vld [vmem:[%s3720_s1 + $0x458] sm:$0xff] }
  0xbe   :  { %1824 = vmatprep.subr.bf16.mxu1 %v2560_v56  ;;  %v2377_v56 = vcombine.low %v45_v12, %v49_v13  ;;  %v2498_v27 = vcombine.high %v165_v23, %v169_v24  ;;  %v2497_v33 = vcombine.low %v165_v23, %v169_v24  ;;  %v101_v24 = vld [vmem:[%s3720_s1 + $0x258] sm:$0xff] }
  0xbf   :  { %1784 = vmatpush2.bf16.msra.mxu0 %v2431_v29  ;;  %v33_v29 = vld [vmem:[%s3720_s1 + $0x38] sm:$0xff] }
  0xc0   :  { %1785 = vmatprep.subr.bf16.mxu0 %v2424_v31  ;;  %v161_v31 = vld [vmem:[%s3720_s1 + $0x438] sm:$0xff]  ;;  %v2362_v34 = vcombine.high %v29_v28, %v33_v29 }
  0xc1   :  { %1825 = vmatpush2.bf16.msra.mxu1 %v2559_v30  ;;  %v157_v30 = vld [vmem:[%s3720_s1 + $0x418] sm:$0xff] }
  0xc2   :  { %1826 = vmatprep.subr.bf16.mxu1 %v2552_v32  ;;  %v2369_v32 = vcombine.low %v37_v21, %v41_v22  ;;  %v2490_v35 = vcombine.high %v157_v30, %v161_v31  ;;  %v2489_v41 = vcombine.low %v157_v30, %v161_v31  ;;  %v93_v31 = vld [vmem:[%s3720_s1 + $0x218] sm:$0xff] }
  0xc3   :  { %1786 = vmatpush2.bf16.msra.mxu0 %v2423_v37  ;;  %v153_v37 = vld [vmem:[%s3720_s1 + $0x3f8] sm:$0xff] }
  0xc4   :  { %1837 = vmatprep.subr.bf16.mxu0 %v2418_v39  ;;  %v281_v39 = vld [vmem:[%s3720_s1 + $0x7f8] sm:$0xff]  ;;  %v2482_v42 = vcombine.high %v149_v36, %v153_v37 }
  0xc5   :  { %1827 = vmatpush2.bf16.msra.mxu1 %v2551_v38  ;;  %v277_v38 = vld [vmem:[%s3720_s1 + $0x7d8] sm:$0xff] }
  0xc6   :  { %1878 = vmatprep.subr.bf16.mxu1 %v2546_v40  ;;  %1788 = vmatmul.mubr.bf16.vlgmr.msra.gmra.mxu0 %v3009_v18  ;;  %v2361_v40 = vcombine.low %v29_v28, %v33_v29  ;;  %v2610_v43 = vcombine.high %v277_v38, %v281_v39  ;;  %v2609_v50 = vcombine.low %v277_v38, %v281_v39 }
  0xc7   :  { %1838 = vmatpush1.bf16.msra.mxu0 %v2417_v45  ;;  %1869 = vmatprep.mubr.bf16.mxu0 %v2891_v3  ;;  %v53_v3 = vld [vmem:[%s3720_s1 + $0xd8] sm:$0xff] }
  0xc8   :  { %1829 = vmatmul.mubr.bf16.vlgmr.msra.gmra.mxu1 %v3025_v59  ;;  %1839 = vmatprep.subr.bf16.mxu0 %v2410_v48  ;;  %v2386_v10 = vcombine.high %v53_v3, %v57_v5  ;;  %v2385_v16 = vcombine.low %v53_v3, %v57_v5  ;;  %v145_v45 = vld [vmem:[%s3720_s1 + $0x3b8] sm:$0xff] }
  0xc9   :  { %1879 = vmatpush1.bf16.msra.mxu1 %v2545_v46  ;;  %1910 = vmatprep.mubr.bf16.mxu1 %v2902_v9  ;;  %v181_v9 = vld [vmem:[%s3720_s1 + $0x4d8] sm:$0xff]  ;;  %v2474_v51 = vcombine.high %v141_v44, %v145_v45 }
  0xca   :  { %1880 = vmatprep.subr.bf16.mxu1 %v2538_v49  ;;  %v2514_v11 = vcombine.high %v181_v9, %v185_v6  ;;  %v2513_v17 = vcombine.low %v181_v9, %v185_v6  ;;  %v269_v46 = vld [vmem:[%s3720_s1 + $0x798] sm:$0xff]  ;;  %v2481_v49 = vcombine.low %v149_v36, %v153_v37 }
  0xcb   :  { %1840 = vmatpush1.bf16.msra.mxu0 %v2409_v54  ;;  %v273_v48 = vld [vmem:[%s3720_s1 + $0x7b8] sm:$0xff] }
  0xcc   :  { %1841 = vmatprep.subr.bf16.mxu0 %v2402_v57  ;;  %v2602_v52 = vcombine.high %v269_v46, %v273_v48  ;;  %v137_v54 = vld [vmem:[%s3720_s1 + $0x378] sm:$0xff]  ;;  %v2601_v60 = vcombine.low %v269_v46, %v273_v48 }
  0xcd   :  { %1881 = vmatpush1.bf16.msra.mxu1 %v2537_v55  ;;  %v261_v55 = vld [vmem:[%s3720_s1 + $0x758] sm:$0xff]  ;;  %v2466_v61 = vcombine.high %v133_v53, %v137_v54 }
  0xce   :  { %1882 = vmatprep.subr.bf16.mxu1 %v2530_v58  ;;  %v265_v57 = vld [vmem:[%s3720_s1 + $0x778] sm:$0xff]  ;;  %v2473_v58 = vcombine.low %v141_v44, %v145_v45 }
  0xcf   :  { %1842 = vmatpush1.bf16.msra.mxu0 %v2401_v0  ;;  %v2594_v62 = vcombine.high %v261_v55, %v265_v57  ;;  %v129_v0 = vld [vmem:[%s3720_s1 + $0x338] sm:$0xff]  ;;  %v2593_v3 = vcombine.low %v261_v55, %v265_v57  ;;  %v2695_v55 = vld [vmem:[%s3721_s2 + $0x28] sm:$0xff]   ;;  %v2696_v57 = vld [vmem:[%s3721_s2 + $0x60] sm:$0xff]  }
  0xd0   :  { %1843 = vmatprep.subr.bf16.mxu0 %v2394_v2  ;;  %v257_v2 = vld [vmem:[%s3720_s1 + $0x738] sm:$0xff]  ;;  %v2458_v5 = vcombine.high %v125_v63, %v129_v0 }
  0xd1   :  { %1883 = vmatpush1.bf16.msra.mxu1 %v2529_v1  ;;  %v253_v1 = vld [vmem:[%s3720_s1 + $0x718] sm:$0xff] }
  0xd2   :  { %1884 = vmatprep.subr.bf16.mxu1 %v2522_v4  ;;  %v2465_v4 = vcombine.low %v133_v53, %v137_v54  ;;  %v2586_v9 = vcombine.high %v253_v1, %v257_v2  ;;  %v117_v6 = vld [vmem:[%s3720_s1 + $0x2d8] sm:$0xff]  ;;  %v2585_v12 = vcombine.low %v253_v1, %v257_v2  ;;  %v2694_v54 = vld [vmem:[%s3721_s2 + $0x68] sm:$0xff]   ;;  %v2704_v2 = vld [vmem:[%s3721_s2 + $0x40] sm:$0xff]  }
  0xd3   :  { %1844 = vmatpush1.bf16.msra.mxu0 %v2393_v7  ;;  %v121_v7 = vld [vmem:[%s3720_s1 + $0x2f8] sm:$0xff]  ;;  %v2703_v1 = vld [vmem:[%s3721_s2 + $0x8] sm:$0xff]  }
  0xd4   :  { %1845 = vmatprep.subr.bf16.mxu0 %v2386_v10  ;;  %v249_v10 = vld [vmem:[%s3720_s1 + $0x6f8] sm:$0xff]  ;;  %v2450_v13 = vcombine.high %v117_v6, %v121_v7 }
  0xd5   :  { %1885 = vmatpush1.bf16.msra.mxu1 %v2521_v8  ;;  %v245_v8 = vld [vmem:[%s3720_s1 + $0x6d8] sm:$0xff] }
  0xd6   :  { %1886 = vmatprep.subr.bf16.mxu1 %v2514_v11  ;;  %v2457_v11 = vcombine.low %v125_v63, %v129_v0  ;;  %v2578_v14 = vcombine.high %v245_v8, %v249_v10  ;;  %v2577_v21 = vcombine.low %v245_v8, %v249_v10  ;;  %v2701_v63 = vld [vmem:[%s3721_s2 + $0x10] sm:$0xff]   ;;  %v2702_v0 = vld [vmem:[%s3721_s2 + $0x48] sm:$0xff]  }
  0xd7   :  { %1846 = vmatpush1.bf16.msra.mxu0 %v2385_v16  ;;  %v113_v16 = vld [vmem:[%s3720_s1 + $0x2b8] sm:$0xff] }
  0xd8   :  { %1847 = vmatprep.subr.bf16.mxu0 %v2378_v19  ;;  %v241_v19 = vld [vmem:[%s3720_s1 + $0x6b8] sm:$0xff]  ;;  %v2442_v22 = vcombine.high %v109_v15, %v113_v16 }
  0xd9   :  { %1887 = vmatpush1.bf16.msra.mxu1 %v2513_v17  ;;  %v237_v17 = vld [vmem:[%s3720_s1 + $0x698] sm:$0xff] }
  0xda   :  { %1888 = vmatprep.subr.bf16.mxu1 %v2506_v20  ;;  %v2449_v20 = vcombine.low %v117_v6, %v121_v7  ;;  %v2570_v23 = vcombine.high %v237_v17, %v241_v19  ;;  %v2569_v28 = vcombine.low %v237_v17, %v241_v19  ;;  %v2710_v19 = vld [vmem:[%s3721_s2 + $0xe8] sm:$0xff]  }
  0xdb   :  { %1848 = vmatpush1.bf16.msra.mxu0 %v2377_v56  ;;  %v105_v56 = vld [vmem:[%s3720_s1 + $0x278] sm:$0xff] }
  0xdc   :  { %1849 = vmatprep.subr.bf16.mxu0 %v2370_v26  ;;  %v233_v26 = vld [vmem:[%s3720_s1 + $0x678] sm:$0xff]  ;;  %v2434_v29 = vcombine.high %v101_v24, %v105_v56 }
  0xdd   :  { %1889 = vmatpush1.bf16.msra.mxu1 %v2505_v25  ;;  %v229_v25 = vld [vmem:[%s3720_s1 + $0x658] sm:$0xff] }
  0xde   :  { %1890 = vmatprep.subr.bf16.mxu1 %v2498_v27  ;;  %v2441_v27 = vcombine.low %v109_v15, %v113_v16  ;;  %v2562_v30 = vcombine.high %v229_v25, %v233_v26  ;;  %v2561_v36 = vcombine.low %v229_v25, %v233_v26  ;;  %v2717_v25 = vld [vmem:[%s3721_s2 + $0x90] sm:$0xff]   ;;  %v2718_v26 = vld [vmem:[%s3721_s2 + $0xc8] sm:$0xff]  }
  0xdf   :  { %1850 = vmatpush1.bf16.msra.mxu0 %v2369_v32  ;;  %v97_v32 = vld [vmem:[%s3720_s1 + $0x238] sm:$0xff] }
  0xe0   :  { %1851 = vmatprep.subr.bf16.mxu0 %v2362_v34  ;;  %v225_v34 = vld [vmem:[%s3720_s1 + $0x638] sm:$0xff]  ;;  %v2426_v37 = vcombine.high %v93_v31, %v97_v32  ;;  %v2425_v39 = vcombine.low %v93_v31, %v97_v32 }
  0xe1   :  { %1891 = vmatpush1.bf16.msra.mxu1 %v2497_v33  ;;  %v221_v33 = vld [vmem:[%s3720_s1 + $0x618] sm:$0xff] }
  0xe2   :  { %1892 = vmatprep.subr.bf16.mxu1 %v2490_v35  ;;  %v2433_v35 = vcombine.low %v101_v24, %v105_v56  ;;  %v2554_v38 = vcombine.high %v221_v33, %v225_v34  ;;  %v2715_v24 = vld [vmem:[%s3721_s2 + $0x98] sm:$0xff]   ;;  %v2716_v56 = vld [vmem:[%s3721_s2 + $0xd0] sm:$0xff]  }
  0xe3   :  { %1852 = vmatpush1.bf16.msra.mxu0 %v2361_v40  ;;  %v2553_v40 = vcombine.low %v221_v33, %v225_v34 }
  0xe4   :  { %1853 = vmatprep.subr.bf16.mxu0 %v2482_v42 }
  0xe5   :  { %1893 = vmatpush1.bf16.msra.mxu1 %v2489_v41  ;;  %v2690_v41 = vld [vmem:[%s3721_s2 + $0x78] sm:$0xff]  }
  0xe6   :  { %1894 = vmatprep.subr.bf16.mxu1 %v2610_v43  ;;  %v2691_v43 = vld [vmem:[%s3721_s2 + $0x38] sm:$0xff]  }
  0xe7   :  { %1854 = vmatpush2.bf16.msra.mxu0 %v2481_v49  ;;  %v2692_v49 = vld [vmem:[%s3721_s2 + $0x70] sm:$0xff]  }
  0xe8   :  { %1855 = vmatprep.subr.bf16.mxu0 %v2474_v51  ;;  %v2693_v51 = vld [vmem:[%s3721_s2 + $0x30] sm:$0xff]  }
  0xe9   :  { %1895 = vmatpush2.bf16.msra.mxu1 %v2609_v50 }
  0xea   :  { %1896 = vmatprep.subr.bf16.mxu1 %v2602_v52 }
  0xeb   :  { %1856 = vmatpush2.bf16.msra.mxu0 %v2473_v58  ;;  %v2697_v58 = vld [vmem:[%s3721_s2 + $0x20] sm:$0xff]  }
  0xec   :  { %1857 = vmatprep.subr.bf16.mxu0 %v2466_v61  ;;  %v2699_v61 = vld [vmem:[%s3721_s2 + $0x18] sm:$0xff]  }
  0xed   :  { %1897 = vmatpush2.bf16.msra.mxu1 %v2601_v60  ;;  %v2698_v60 = vld [vmem:[%s3721_s2 + $0x58] sm:$0xff]  }
  0xee   :  { %1898 = vmatprep.subr.bf16.mxu1 %v2594_v62  ;;  %v2700_v62 = vld [vmem:[%s3721_s2 + $0x50] sm:$0xff]  }
  0xef   :  { %1858 = vmatpush2.bf16.msra.mxu0 %v2465_v4  ;;  %v2705_v4 = vld [vmem:[%s3721_s2] sm:$0xff]  }
  0xf0   :  { %1859 = vmatprep.subr.bf16.mxu0 %v2458_v5 }
  0xf1   :  { %1899 = vmatpush2.bf16.msra.mxu1 %v2593_v3  ;;  %v2706_v3 = vld [vmem:[%s3721_s2 + $0xf8] sm:$0xff]  }
  0xf2   :  { %1900 = vmatprep.subr.bf16.mxu1 %v2586_v9  ;;  %v2707_v9 = vld [vmem:[%s3721_s2 + $0xb8] sm:$0xff]  }
  0xf3   :  { %1860 = vmatpush2.bf16.msra.mxu0 %v2457_v11  ;;  %v2708_v11 = vld [vmem:[%s3721_s2 + $0xf0] sm:$0xff]  }
  0xf4   :  { %1861 = vmatprep.subr.bf16.mxu0 %v2450_v13 }
  0xf5   :  { %1901 = vmatpush2.bf16.msra.mxu1 %v2585_v12 }
  0xf6   :  { %1902 = vmatprep.subr.bf16.mxu1 %v2578_v14  ;;  %v2709_v14 = vld [vmem:[%s3721_s2 + $0xb0] sm:$0xff]  }
  0xf7   :  { %1862 = vmatpush2.bf16.msra.mxu0 %v2449_v20  ;;  %v2711_v20 = vld [vmem:[%s3721_s2 + $0xa8] sm:$0xff]  }
  0xf8   :  { %1863 = vmatprep.subr.bf16.mxu0 %v2442_v22  ;;  %v2713_v22 = vld [vmem:[%s3721_s2 + $0xa0] sm:$0xff]  }
  0xf9   :  { %1903 = vmatpush2.bf16.msra.mxu1 %v2577_v21  ;;  %v2712_v21 = vld [vmem:[%s3721_s2 + $0xe0] sm:$0xff]  }
  0xfa   :  { %1904 = vmatprep.subr.bf16.mxu1 %v2570_v23  ;;  %v2714_v23 = vld [vmem:[%s3721_s2 + $0xd8] sm:$0xff]  }
  0xfb   :  { %1864 = vmatpush2.bf16.msra.mxu0 %v2441_v27  ;;  %v2719_v27 = vld [vmem:[%s3721_s2 + $0x88] sm:$0xff]  }
  0xfc   :  { %1865 = vmatprep.subr.bf16.mxu0 %v2434_v29  ;;  %v2721_v29 = vld [vmem:[%s3721_s2 + $0x80] sm:$0xff]  }
  0xfd   :  { %1905 = vmatpush2.bf16.msra.mxu1 %v2569_v28  ;;  %v2720_v28 = vld [vmem:[%s3721_s2 + $0xc0] sm:$0xff]  }
  0xfe   :  { %1906 = vmatprep.subr.bf16.mxu1 %v2562_v30 }
  0xff   :  { %1866 = vmatpush2.bf16.msra.mxu0 %v2433_v35 }
 0x100   :  { %1867 = vmatprep.subr.bf16.mxu0 %v2426_v37 }
 0x101   :  { %1907 = vmatpush2.bf16.msra.mxu1 %v2561_v36 }
 0x102   :  { %1908 = vmatprep.subr.bf16.mxu1 %v2554_v38 }
 0x103   :  { %1868 = vmatpush2.bf16.msra.mxu0 %v2425_v39 }
 0x104   :  { %2643 = vmatprep.subr.bf16.mxu0 %v2690_v41 }
 0x105   :  { %1909 = vmatpush2.bf16.msra.mxu1 %v2553_v40 }
 0x106   :  { %v1625_v42 = vpop.f32.mrf.mxu0  ;;  %1870 = vmatmul.mubr.bf16.vlgmr.msra.gmra.mxu0 %v3009_v18  ;;  %2665 = vmatprep.subr.bf16.mxu1 %v2706_v3 }
 0x107   :  { %2644 = vmatpush3.bf16.msra.mxu0 %v2691_v43 }
 0x108   :  { %v1666_v44 = vpop.f32.mrf.mxu1  ;;  %1911 = vmatmul.mubr.bf16.vlgmr.msra.gmra.mxu1 %v3025_v59  ;;  %v1627_v46 = vpop.f32.mrf.mxu0  ;;  %2645 = vmatprep.subr.bf16.mxu0 %v2692_v49 }
 0x109   :  { %v3599_v45 = vadd.f32 %v1666_v44, %v1625_v42  ;;  %2666 = vmatpush3.bf16.msra.mxu1 %v2707_v9 }
 0x10a   :  { %v1668_v48 = vpop.f32.mrf.mxu1  ;;  %v1629_v18 = vpop.f32.mrf.mxu0  ;;  %2667 = vmatprep.subr.bf16.mxu1 %v2708_v11 }
 0x10b   :  { %v3604_v50 = vadd.f32 %v1668_v48, %v1627_v46  ;;  %2646 = vmatpush3.bf16.msra.mxu0 %v2693_v51  ;;  %v1919_v35 = vmul.f32 %v3599_v45, %v3599_v45 }
 0x10c   :  { %v1670_v52 = vpop.f32.mrf.mxu1  ;;  %v1630_v59 = vpop.f32.mrf.mxu0  ;;  %2647 = vmatprep.subr.bf16.mxu0 %v2694_v54 }
 0x10d   :  { %2668 = vmatpush3.bf16.msra.mxu1 %v2709_v14  ;;  %v1920_v40 = vmul.f32 %v3604_v50, %v3604_v50 }
 0x10e   :  { %v1671_v53 = vpop.f32.mrf.mxu1  ;;  %2669 = vmatprep.subr.bf16.mxu1 %v2710_v19 }
 0x10f   :  { %2648 = vmatpush3.bf16.msra.mxu0 %v2695_v55 }
 0x110   :  { %2649 = vmatprep.subr.bf16.mxu0 %v2696_v57 }
 0x111   :  { %2670 = vmatpush3.bf16.msra.mxu1 %v2711_v20 }
 0x112   :  { %2671 = vmatprep.subr.bf16.mxu1 %v2712_v21 }
 0x113   :  { %2650 = vmatpush3.bf16.msra.mxu0 %v2697_v58 }
 0x114   :  { %2651 = vmatprep.subr.bf16.mxu0 %v2698_v60 }
 0x115   :  { %2672 = vmatpush3.bf16.msra.mxu1 %v2713_v22 }
 0x116   :  { %2673 = vmatprep.subr.bf16.mxu1 %v2714_v23 }
 0x117   :  { %2652 = vmatpush3.bf16.msra.mxu0 %v2699_v61 }
 0x118   :  { %2653 = vmatprep.subr.bf16.mxu0 %v2700_v62 }
 0x119   :  { %2674 = vmatpush3.bf16.msra.mxu1 %v2715_v24 }
 0x11a   :  { %2675 = vmatprep.subr.bf16.mxu1 %v2716_v56 }
 0x11b   :  { %2654 = vmatpush3.bf16.msra.mxu0 %v2701_v63 }
 0x11c   :  { %2655 = vmatprep.subr.bf16.mxu0 %v2702_v0 }
 0x11d   :  { %2676 = vmatpush3.bf16.msra.mxu1 %v2717_v25 }
 0x11e   :  { %2677 = vmatprep.subr.bf16.mxu1 %v2718_v26 }
 0x11f   :  { %2656 = vmatpush3.bf16.msra.mxu0 %v2703_v1 }
 0x120   :  { %2657 = vmatprep.subr.bf16.mxu0 %v2704_v2 }
 0x121   :  { %2678 = vmatpush3.bf16.msra.mxu1 %v2719_v27 }
 0x122   :  { %2679 = vmatprep.subr.bf16.mxu1 %v2720_v28 }
 0x123   :  { %2658 = vmatpush3.bf16.msra.mxu0 %v2705_v4 }
 0x125   :  { %2680 = vmatpush3.bf16.msra.mxu1 %v2721_v29 }
 0x146   :  { %v1707_v5 = vpop.f32.mrf.mxu0 }
 0x148   :  { %v1748_v6 = vpop.f32.mrf.mxu1  ;;  %v1709_v8 = vpop.f32.mrf.mxu0 }
 0x149   :  { %v3651_v7 = vadd.f32 %v1748_v6, %v1707_v5 }
 0x14a   :  { %v1750_v10 = vpop.f32.mrf.mxu1  ;;  %v1711_v13 = vpop.f32.mrf.mxu0 }
 0x14b   :  { %v3656_v12 = vadd.f32 %v1750_v10, %v1709_v8  ;;  %v1921_v62 = vmul.f32 %v3651_v7, %v3651_v7 }
 0x14c   :  { %v1752_v15 = vpop.f32.mrf.mxu1  ;;  %v1712_v16 = vpop.f32.mrf.mxu0 }
 0x14d   :  { %v1922_v4 = vmul.f32 %v3656_v12, %v3656_v12  ;;  %v2755_v12 = vmov 0.0  }
 0x14e   :  { %v1753_v17 = vpop.f32.mrf.mxu1  ;;  %24 = vst.msk [vmem:[#allocation2] sm:$0x3] %vm23_vm0, %v2755_v12 }
 0x155   :  { %v1947_v28 = vld [vmem:[#allocation2] sm:$0x3] }
 0x186   :  { %v1789_v30 = vpop.f32.mrf.mxu0 }
 0x188   :  { %v1830_v31 = vpop.f32.mrf.mxu1  ;;  %v1791_v33 = vpop.f32.mrf.mxu0 }
 0x189   :  { %v1831_v32 = vadd.f32 %v1830_v31, %v1789_v30 }
 0x18a   :  { %v1832_v34 = vpop.f32.mrf.mxu1  ;;  %v1793_v38 = vpop.f32.mrf.mxu0 }
 0x18b   :  { %v1923_v36 = vmul.f32 %v1831_v32, %v1831_v32  ;;  %v1833_v37 = vadd.f32 %v1832_v34, %v1791_v33  ;;  %v2298_v33 = vsub.s32 0, %v2854_v47  ;;  %v2294_v34 = vld [vmem:[%s3722_s3] sm:$0x7]  ;;  %s2756_s3 = smov [#allocation3]  }
 0x18c   :  { %v1834_v39 = vpop.f32.mrf.mxu1  ;;  %v1794_v43 = vpop.f32.mrf.mxu0  ;;  %s2346_s26 = sshll.u32 %s2756_s3, 4  ;;  %s2347_s26 = int_to_ptr.vmem [resolvable:$true] %s2346_s26 }
 0x18d   :  { %v1927_v41 = vadd.f32 %v1923_v36, %v1919_v35  ;;  %v1924_v42 = vmul.f32 %v1833_v37, %v1833_v37  ;;  %v2299_v35 = vrot.slane %v2294_v34, %v2298_v33  ;;  %s2732_s27 = scalar_lea.vmem %s2347_s26, 32  ;;  %p2737_p1 = scmp.lt.s32.totalorder %s2347_s26, %s2347_s26 }
 0x18e   :  { %v1835_v44 = vpop.f32.mrf.mxu1  ;;  %p2733_p0 = scmp.ne.s32.totalorder %s2347_s26, %s2732_s27  ;;  %p2738_p2 = scmp.lt.s32.totalorder %s2732_s27, %s2732_s27 }
 0x18f   :  { %v1931_v46 = vmax.f32 %v1927_v41, 1e-05  ;;  %v1928_v48 = vadd.f32 %v1924_v42, %v1920_v40 }
 0x190   :  { %p2739_p3 = por %p2738_p2, %p2737_p1 }
 0x191   :  { %2722 = vlog2.f32 %v1931_v46  ;;  %v1932_v49 = vmax.f32 %v1928_v48, 1e-05 }
 0x192   :  { %p2740_p4 = pnand %p2739_p3, %p2733_p0 }
 0x193   :  { %2724 = vlog2.f32 %v1932_v49 }
 0x19e   :  { %v2723_v18 = vpop.eup %2722 }
 0x19f   :  { %v1936_v51 = vmul.f32 0.6931472, %v2723_v18 }
 0x1a0   :  { %v2725_v52 = vpop.eup %2724 }
 0x1a1   :  { %v1938_v45 = vmul.f32 0.6931472, %v2725_v52  ;;  %v1943_v59 = vmul.f32 4.3429446, %v1936_v51 }
 0x1a3   :  { %v1944_v53 = vmul.f32 4.3429446, %v1938_v45  ;;  %v1948_v55 = vpack.c.bf16 %v1943_v59, %v1943_v59 }
 0x1a5   :  { %v1949_v54 = vpack.c.bf16 %v1944_v53, %v1944_v53 }
 0x1a7   :  { %2240 = vmatprep.mubr.bf16.mxu0 %v1949_v54 }
 0x1a8   :  { %2241 = vmatmul.mubr.bf16.vlgmr.msra.gmra.mxu0 %v1948_v55 }
 0x1c6   :  { %v1871_v50 = vpop.f32.mrf.mxu0 }
 0x1c8   :  { %v1912_v57 = vpop.f32.mrf.mxu1  ;;  %v1873_v60 = vpop.f32.mrf.mxu0 }
 0x1c9   :  { %v1913_v58 = vadd.f32 %v1912_v57, %v1871_v50 }
 0x1ca   :  { %v1914_v61 = vpop.f32.mrf.mxu1  ;;  %v1875_v1 = vpop.f32.mrf.mxu0 }
 0x1cb   :  { %v1925_v63 = vmul.f32 %v1913_v58, %v1913_v58  ;;  %v1915_v0 = vadd.f32 %v1914_v61, %v1873_v60  ;;  %v2331_v61 = vsub.s32 1, %v2854_v47  ;;  %v2336_v1 = vsub.s32 2, %v2854_v47 }
 0x1cc   :  { %v1916_v2 = vpop.f32.mrf.mxu1  ;;  %v1876_v9 = vpop.f32.mrf.mxu0 }
 0x1cd   :  { %v1929_v3 = vadd.f32 %v1925_v63, %v1921_v62  ;;  %v1926_v5 = vmul.f32 %v1915_v0, %v1915_v0 }
 0x1ce   :  { %v1917_v6 = vpop.f32.mrf.mxu1 }
 0x1cf   :  { %v1933_v8 = vmax.f32 %v1929_v3, 1e-05  ;;  %v1930_v10 = vadd.f32 %v1926_v5, %v1922_v4 }
 0x1d1   :  { %2726 = vlog2.f32 %v1933_v8  ;;  %v1934_v11 = vmax.f32 %v1930_v10, 1e-05 }
 0x1d3   :  { %2728 = vlog2.f32 %v1934_v11 }
 0x1de   :  { %v2727_v13 = vpop.eup %2726 }
 0x1df   :  { %v1940_v14 = vmul.f32 0.6931472, %v2727_v13 }
 0x1e0   :  { %v2729_v15 = vpop.eup %2728 }
 0x1e1   :  { %v1942_v7 = vmul.f32 0.6931472, %v2729_v15  ;;  %v1945_v16 = vmul.f32 4.3429446, %v1940_v14 }
 0x1e3   :  { %v1946_v17 = vmul.f32 4.3429446, %v1942_v7  ;;  %v1950_v20 = vpack.c.bf16 %v1945_v16, %v1945_v16 }
 0x1e5   :  { %v1951_v19 = vpack.c.bf16 %v1946_v17, %v1946_v17 }
 0x1e7   :  { %2280 = vmatprep.mubr.bf16.mxu1 %v1951_v19 }
 0x1e8   :  { %2281 = vmatmul.mubr.bf16.vlgmr.msra.gmra.mxu1 %v1950_v20 }
 0x268   :  { %v2659_v21 = vpop.f32.mrf.mxu0 }
 0x26a   :  { %v2660_v22 = vpop.f32.mrf.mxu0 }
 0x26b   :  { %v2661_v23 = vadd.f32 %v2660_v22, %v2659_v21 }
 0x26c   :  { %v2662_v24 = vpop.f32.mrf.mxu0 }
 0x26e   :  { %v2663_v56 = vpop.f32.mrf.mxu0 }
 0x2a8   :  { %v2681_v25 = vpop.f32.mrf.mxu1 }
 0x2aa   :  { %v2682_v26 = vpop.f32.mrf.mxu1 }
 0x2ab   :  { %v2683_v27 = vadd.f32 %v2682_v26, %v2681_v25 }
 0x2ac   :  { %v2684_v29 = vpop.f32.mrf.mxu1 }
 0x2ad   :  { %v2283_v30 = vadd.f32 %v2683_v27, %v2661_v23 }
 0x2ae   :  { %v2685_v31 = vpop.f32.mrf.mxu1 }
 0x2af   :  { %v2288_v32 = vadd.f32 %v2283_v30, %v1947_v28 }
 0x2b1   :  { %2290 = vst.msk [vmem:[#allocation2] sm:$0x3] %vm23_vm0, %v2288_v32 }
 0x2b8   :  { %v2295_v36 = vld [vmem:[#allocation2] sm:$0x3] }
 0x2b9   :  { %v2300_v37 = vadd.f32 %v2299_v35, %v2295_v36 }
 0x2bb   :  { %v2301_v38 = vmax.f32 %v2300_v37, 0.0 }
 0x2bd   :  { %v2302_v39 = vsel %vm23_vm0, %v2301_v38, 0.0 }
 0x2be   :  { %v2303_v40 = vrot.slane %v2302_v39, 4 }
 0x2c0   :  { %v2304_v41 = vadd.f32 %v2303_v40, %v2302_v39 }
 0x2c2   :  { %v2305_v42 = vrot.slane %v2304_v41, 2 }
 0x2c4   :  { %v2306_v43 = vadd.f32 %v2305_v42, %v2304_v41 }
 0x2c6   :  { %v2307_v44 = vrot.slane %v2306_v43, 1 }
 0x2c8   :  { %v2308_v46 = vadd.f32 %v2307_v44, %v2306_v43 }
 0x2ca   :  { %v2310_v48 = vmul.f32 0.5, %v2308_v46 }
 0x2cc   :  { %v2311_v49 = vsub.f32 %v2301_v38, %v2310_v48 }
 0x2ce   :  { %v2312_v18 = vmul.f32 %v2311_v49, %v2311_v49 }
 0x2d0   :  { %v2313_v51 = vsel %vm23_vm0, %v2312_v18, 0.0 }
 0x2d1   :  { %v2314_v52 = vrot.slane %v2313_v51, 4 }
 0x2d3   :  { %v2315_v45 = vadd.f32 %v2314_v52, %v2313_v51 }
 0x2d5   :  { %v2316_v59 = vrot.slane %v2315_v45, 2 }
 0x2d7   :  { %v2317_v53 = vadd.f32 %v2316_v59, %v2315_v45 }
 0x2d9   :  { %v2318_v54 = vrot.slane %v2317_v53, 1 }
 0x2db   :  { %v2319_v55 = vadd.f32 %v2318_v54, %v2317_v53 }
 0x2dd   :  { %v2320_v50 = vmul.f32 0.5, %v2319_v55 }
 0x2df   :  { %v2321_v57 = vadd.f32 1e-05, %v2320_v50 }
 0x2e1   :  { %2730 = vrsqrt.f32 %v2321_v57 }
 0x2ee   :  { %v2731_v58 = vpop.eup %2730 }
 0x2ef   :  { %v2323_v60 = vmul.f32 %v2731_v58, %v2294_v34 }
 0x2f1   :  { %v2324_v62 = vmul.f32 %v2323_v60, %v2310_v48  ;;  %v2332_v0 = vrot.slane %v2323_v60, %v2331_v61 }
 0x2f3   :  { %v2326_v63 = vrot.slane %v2324_v62, 7  ;;  %v2333_v4 = vmul.f32 %v2332_v0, %v2301_v38 }
 0x2f5   :  { %v2328_v2 = vsub.f32 %v2294_v34, %v2326_v63 }
 0x2f7   :  { %v2337_v3 = vrot.slane %v2328_v2, %v2336_v1 }
 0x2f9   :  { %v2338_v5 = vadd.f32 %v2337_v3, %v2333_v4 }
 0x2fb   :  { %2339 = vst.msk [vmem:[#allocation3] sm:$0x3] %vm23_vm0, %v2338_v5 }
 0x2fc   :  { %2743 = shalt.err (!%p2740_p4)
}
 0x2fd   :  { %2349 = dma.vmem_to_hbm [thread:$0]  %s2347_s26, 32, %s3723_s4, [#allocation4]  }
 0x2fe   :  { %2752 = dma.done.wait [#allocation4], 32  }
 0x2ff   :  { %2753 = vsyncadd [#allocation4], 4294967264 }
 0x300   :  { %2353 = vsyncpa [#allocation4], 1 }

</bundles_post_ra>
